<compile_context>
chip_gen: v6e
topology: v6e:2x2x1
jax: 0.10.0
libtpu: 0.0.40
codegen_flags: <defaults>
</compile_context>

<pallas_src>
from functools import partial

import jax
import jax.numpy as jnp
import numpy as np
from jax.experimental import pallas as pl
from jax.experimental.pallas import tpu as pltpu

EMBEDDING_DIM = 64
H_DIM = 64
SELF_STATE_DIM = 6


def _encoder_kernel(state_ref, w_emb_ref, b_emb_ref, w_ih_ref, w_hh_ref, b_ref,
                    out_ref, *, seq_len, h_dim):
    T, H = seq_len, h_dim

    # ---- input glue, folded into the kernel ---------------------------------
    x = state_ref[...].astype(jnp.float32)                 # (T, B, D)
    px = x[:, :, SELF_STATE_DIM:SELF_STATE_DIM + 1]        # (T, B, 1)
    py = x[:, :, SELF_STATE_DIM + 1:SELF_STATE_DIM + 2]    # (T, B, 1)

    # Spatial embedding ReLU(xy @ W_emb + b_emb) as VPU broadcast-FMAs
    # (K=2 is far too small for the MXU).
    emb = jnp.maximum(px * w_emb_ref[0:1, :]
                      + py * w_emb_ref[1:2, :]
                      + b_emb_ref[...], 0.0)               # (T, B, E)

    w_ih = w_ih_ref[...]                                    # (E, 4H) [i,f,o,g]
    w_hh = w_hh_ref[...]                                    # (H, 4H) [i,f,o,g]
    b = b_ref[...]                                          # (1, 4H)

    # ---- hoisted, recurrence-independent precompute --------------------------
    # Input contribution to the LSTM gates for every timestep, kept as SSA
    # values (no VMEM scratch round-trip).  These matmuls have no dependence
    # on h/c, so their MXU pushes can overlap the serial loop below.
    g_all = [jnp.dot(emb[t], w_ih, preferred_element_type=jnp.float32) + b
             for t in range(T)]                              # T x (B, 4H)

    B = x.shape[1]
    h = jnp.zeros((B, H), jnp.float32)
    c = jnp.zeros((B, H), jnp.float32)

    # TODO(synk): hold W_hh resident in the MXU across steps via
    # pltpu.matmul_push_rhs / matmul_acc_lhs / matmul_pop once the per-pop
    # accumulator-reset semantics are confirmed; jnp.dot re-pushes the RHS
    # each of the T serial steps.

    # ---- strictly sequential recurrence (fully unrolled, T=8) ----------------
    for t in range(T):
        gates = g_all[t] + jnp.dot(h, w_hh, preferred_element_type=jnp.float32)
        # sigmoid(x) == 0.5*tanh(0.5*x) + 0.5 : one EUP pass for the whole
        # contiguous [i|f|o] block instead of exp + reciprocal.
        ifo = 0.5 * jnp.tanh(0.5 * gates[:, :3 * H]) + 0.5  # (B, 3H)
        g_t = jnp.tanh(gates[:, 3 * H:])                     # (B, H)
        i_g = ifo[:, 0 * H:1 * H]
        f_g = ifo[:, 1 * H:2 * H]
        o_g = ifo[:, 2 * H:3 * H]
        c = f_g * c + i_g * g_t
        h = o_g * jnp.tanh(c)
        out_ref[t] = h                                       # (B, H) store


def _permute_gates_ifgo_to_ifog(w):
    """Reorder the last (4H) axis from PyTorch's [i, f, g, o] to [i, f, o, g]."""
    H = H_DIM
    return jnp.concatenate(
        [w[..., :2 * H], w[..., 3 * H:4 * H], w[..., 2 * H:3 * H]], axis=-1)


def prepare_encoder_params(params):
    """One-time weight prep (NOT per-forward glue): permute gate columns."""
    return {
        "w_emb": params["w_emb"],
        "b_emb": params["b_emb"],
        "w_ih": _permute_gates_ifgo_to_ifog(params["w_ih"]),
        "w_hh": _permute_gates_ifgo_to_ifog(params["w_hh"]),
        "b": _permute_gates_ifgo_to_ifog(params["b"]),
    }


def encoder_forward(state, prep):
    """state: (seq_len, lstm_batch, joint_dim) f32 -> (seq_len, lstm_batch, H_DIM)."""
    T, B, _ = state.shape
    H = H_DIM
    vmem = pl.BlockSpec(memory_space=pltpu.MemorySpace.VMEM)
    kernel = partial(_encoder_kernel, seq_len=T, h_dim=H)

    return pl.pallas_call(
        kernel,
        out_shape=jax.ShapeDtypeStruct((T, B, H), jnp.float32),
        in_specs=[vmem] * 6,      # full arrays, DMA'd into VMEM once
        out_specs=vmem,           # final output written directly, no post-glue
    )(state, prep["w_emb"], prep["b_emb"], prep["w_ih"], prep["w_hh"], prep["b"])


def init_params(key):
    """Deterministic synthetic parameters (PyTorch default-style uniform init)."""
    E, H = EMBEDDING_DIM, H_DIM
    k_emb = 1.0 / np.sqrt(2.0)
    k_lstm = 1.0 / np.sqrt(H)
    ks = jax.random.split(key, 6)
    # Stored transposed relative to PyTorch: (in_features, out_features).
    w_emb = jax.random.uniform(ks[0], (2, E), jnp.float32, -k_emb, k_emb)
    b_emb = jax.random.uniform(ks[1], (1, E), jnp.float32, -k_emb, k_emb)
    # Gate order matches PyTorch: [i, f, g, o] along the 4H axis.
    w_ih = jax.random.uniform(ks[2], (E, 4 * H), jnp.float32, -k_lstm, k_lstm)
    w_hh = jax.random.uniform(ks[3], (H, 4 * H), jnp.float32, -k_lstm, k_lstm)
    b_ih = jax.random.uniform(ks[4], (1, 4 * H), jnp.float32, -k_lstm, k_lstm)
    b_hh = jax.random.uniform(ks[5], (1, 4 * H), jnp.float32, -k_lstm, k_lstm)
    return {"w_emb": w_emb, "b_emb": b_emb, "w_ih": w_ih, "w_hh": w_hh,
            "b": b_ih + b_hh}


def encoder_reference(state, params):
    """Pure-JAX reference (uses the original PyTorch [i,f,g,o] gate order)."""
    inp = state[:, :, SELF_STATE_DIM:SELF_STATE_DIM + 2].astype(jnp.float32)
    emb = jnp.maximum(inp @ params["w_emb"] + params["b_emb"], 0.0)
    H = H_DIM
    B = state.shape[1]

    def step(carry, x):
        h, c = carry
        gates = x @ params["w_ih"] + h @ params["w_hh"] + params["b"]
        i = jax.nn.sigmoid(gates[:, 0 * H:1 * H])
        f = jax.nn.sigmoid(gates[:, 1 * H:2 * H])
        g = jnp.tanh(gates[:, 2 * H:3 * H])
        o = jax.nn.sigmoid(gates[:, 3 * H:4 * H])
        c = f * c + i * g
        h = o * jnp.tanh(c)
        return (h, c), h

    init = (jnp.zeros((B, H), jnp.float32), jnp.zeros((B, H), jnp.float32))
    _, outs = jax.lax.scan(step, init, emb)
    return outs


if __name__ == "__main__":
    key = jax.random.PRNGKey(0)
    pkey, skey = jax.random.split(key)

    seq_len = 8       # "batch_size" axis of the joint state (LSTM time axis)
    n_humans = 5      # LSTM batch
    joint_dim = 13    # 6 self-state dims + 7 human-state dims

    params = init_params(pkey)
    prep = prepare_encoder_params(params)   # one-time weight prep
    state = jax.random.normal(skey, (seq_len, n_humans, joint_dim), jnp.float32)

    out = encoder_forward(state, prep)
    out = jax.block_until_ready(out)

    ref = encoder_reference(state, params)
    np.testing.assert_allclose(np.asarray(out), np.asarray(ref), rtol=1e-5, atol=1e-5)

    print("KERNEL_OK")
</pallas_src>

<mosaic_0001>
module attributes {stable_mosaic.version = 11 : i64} {
  func.func @_encoder_kernel(%arg0: memref<8x5x13xf32, #tpu.memory_space<vmem>>, %arg1: memref<2x64xf32, #tpu.memory_space<vmem>>, %arg2: memref<1x64xf32, #tpu.memory_space<vmem>>, %arg3: memref<64x256xf32, #tpu.memory_space<vmem>>, %arg4: memref<64x256xf32, #tpu.memory_space<vmem>>, %arg5: memref<1x256xf32, #tpu.memory_space<vmem>>, %arg6: memref<8x5x64xf32, #tpu.memory_space<vmem>>) attributes {dimension_semantics = [], scalar_prefetch = 0 : i64, scratch_operands = 0 : i64, tpu.core_type = #tpu.core_type<tc>} {
    %c0 = arith.constant 0 : index
    %c0_0 = arith.constant 0 : index
    %c0_1 = arith.constant 0 : index
    %0 = vector.load %arg0[%c0, %c0_0, %c0_1] : memref<8x5x13xf32, #tpu.memory_space<vmem>>, vector<8x5x13xf32>
    %1 = vector.extract_strided_slice %0 {offsets = [0, 0, 6], sizes = [8, 5, 1], strides = [1, 1, 1]} : vector<8x5x13xf32> to vector<8x5x1xf32>
    %2 = vector.extract_strided_slice %0 {offsets = [0, 0, 7], sizes = [8, 5, 1], strides = [1, 1, 1]} : vector<8x5x13xf32> to vector<8x5x1xf32>
    %c0_2 = arith.constant 0 : index
    %c0_3 = arith.constant 0 : index
    %3 = vector.load %arg1[%c0_2, %c0_3] : memref<2x64xf32, #tpu.memory_space<vmem>>, vector<1x64xf32>
    %4 = vector.shape_cast %3 : vector<1x64xf32> to vector<1x1x64xf32>
    %5 = vector.broadcast %1 : vector<8x5x1xf32> to vector<8x5x64xf32>
    %6 = vector.broadcast %4 : vector<1x1x64xf32> to vector<8x5x64xf32>
    %7 = arith.mulf %5, %6 : vector<8x5x64xf32>
    %c1 = arith.constant 1 : index
    %c0_4 = arith.constant 0 : index
    %8 = vector.load %arg1[%c1, %c0_4] : memref<2x64xf32, #tpu.memory_space<vmem>>, vector<1x64xf32>
    %9 = vector.shape_cast %8 : vector<1x64xf32> to vector<1x1x64xf32>
    %10 = vector.broadcast %2 : vector<8x5x1xf32> to vector<8x5x64xf32>
    %11 = vector.broadcast %9 : vector<1x1x64xf32> to vector<8x5x64xf32>
    %12 = arith.mulf %10, %11 : vector<8x5x64xf32>
    %13 = arith.addf %7, %12 : vector<8x5x64xf32>
    %c0_5 = arith.constant 0 : index
    %c0_6 = arith.constant 0 : index
    %14 = vector.load %arg2[%c0_5, %c0_6] : memref<1x64xf32, #tpu.memory_space<vmem>>, vector<1x64xf32>
    %15 = vector.shape_cast %14 : vector<1x64xf32> to vector<1x1x64xf32>
    %16 = vector.broadcast %15 : vector<1x1x64xf32> to vector<8x5x64xf32>
    %17 = arith.addf %13, %16 : vector<8x5x64xf32>
    %cst = arith.constant 0.000000e+00 : f32
    %18 = vector.broadcast %cst : f32 to vector<8x5x64xf32>
    %19 = arith.maximumf %17, %18 : vector<8x5x64xf32>
    %c0_7 = arith.constant 0 : index
    %c0_8 = arith.constant 0 : index
    %20 = vector.load %arg3[%c0_7, %c0_8] : memref<64x256xf32, #tpu.memory_space<vmem>>, vector<64x256xf32>
    %c0_9 = arith.constant 0 : index
    %c0_10 = arith.constant 0 : index
    %21 = vector.load %arg4[%c0_9, %c0_10] : memref<64x256xf32, #tpu.memory_space<vmem>>, vector<64x256xf32>
    %c0_11 = arith.constant 0 : index
    %c0_12 = arith.constant 0 : index
    %22 = vector.load %arg5[%c0_11, %c0_12] : memref<1x256xf32, #tpu.memory_space<vmem>>, vector<1x256xf32>
    %23 = vector.extract_strided_slice %19 {offsets = [0, 0, 0], sizes = [1, 5, 64], strides = [1, 1, 1]} : vector<8x5x64xf32> to vector<1x5x64xf32>
    %24 = vector.shape_cast %23 : vector<1x5x64xf32> to vector<5x64xf32>
    %cst_13 = arith.constant dense<0.000000e+00> : vector<5x256xf32>
    %25 = tpu.matmul %24, %20, %cst_13 {dimension_numbers = #tpu.dot_dimension_numbers<[1], [0], [0], [1], [0, 0, 1, 1], [], []>} : vector<5x64xf32>, vector<64x256xf32>, vector<5x256xf32> -> vector<5x256xf32>
    %26 = vector.broadcast %22 : vector<1x256xf32> to vector<5x256xf32>
    %27 = arith.addf %25, %26 : vector<5x256xf32>
    %28 = vector.extract_strided_slice %19 {offsets = [1, 0, 0], sizes = [1, 5, 64], strides = [1, 1, 1]} : vector<8x5x64xf32> to vector<1x5x64xf32>
    %29 = vector.shape_cast %28 : vector<1x5x64xf32> to vector<5x64xf32>
    %cst_14 = arith.constant dense<0.000000e+00> : vector<5x256xf32>
    %30 = tpu.matmul %29, %20, %cst_14 {dimension_numbers = #tpu.dot_dimension_numbers<[1], [0], [0], [1], [0, 0, 1, 1], [], []>} : vector<5x64xf32>, vector<64x256xf32>, vector<5x256xf32> -> vector<5x256xf32>
    %31 = vector.broadcast %22 : vector<1x256xf32> to vector<5x256xf32>
    %32 = arith.addf %30, %31 : vector<5x256xf32>
    %33 = vector.extract_strided_slice %19 {offsets = [2, 0, 0], sizes = [1, 5, 64], strides = [1, 1, 1]} : vector<8x5x64xf32> to vector<1x5x64xf32>
    %34 = vector.shape_cast %33 : vector<1x5x64xf32> to vector<5x64xf32>
    %cst_15 = arith.constant dense<0.000000e+00> : vector<5x256xf32>
    %35 = tpu.matmul %34, %20, %cst_15 {dimension_numbers = #tpu.dot_dimension_numbers<[1], [0], [0], [1], [0, 0, 1, 1], [], []>} : vector<5x64xf32>, vector<64x256xf32>, vector<5x256xf32> -> vector<5x256xf32>
    %36 = vector.broadcast %22 : vector<1x256xf32> to vector<5x256xf32>
    %37 = arith.addf %35, %36 : vector<5x256xf32>
    %38 = vector.extract_strided_slice %19 {offsets = [3, 0, 0], sizes = [1, 5, 64], strides = [1, 1, 1]} : vector<8x5x64xf32> to vector<1x5x64xf32>
    %39 = vector.shape_cast %38 : vector<1x5x64xf32> to vector<5x64xf32>
    %cst_16 = arith.constant dense<0.000000e+00> : vector<5x256xf32>
    %40 = tpu.matmul %39, %20, %cst_16 {dimension_numbers = #tpu.dot_dimension_numbers<[1], [0], [0], [1], [0, 0, 1, 1], [], []>} : vector<5x64xf32>, vector<64x256xf32>, vector<5x256xf32> -> vector<5x256xf32>
    %41 = vector.broadcast %22 : vector<1x256xf32> to vector<5x256xf32>
    %42 = arith.addf %40, %41 : vector<5x256xf32>
    %43 = vector.extract_strided_slice %19 {offsets = [4, 0, 0], sizes = [1, 5, 64], strides = [1, 1, 1]} : vector<8x5x64xf32> to vector<1x5x64xf32>
    %44 = vector.shape_cast %43 : vector<1x5x64xf32> to vector<5x64xf32>
    %cst_17 = arith.constant dense<0.000000e+00> : vector<5x256xf32>
    %45 = tpu.matmul %44, %20, %cst_17 {dimension_numbers = #tpu.dot_dimension_numbers<[1], [0], [0], [1], [0, 0, 1, 1], [], []>} : vector<5x64xf32>, vector<64x256xf32>, vector<5x256xf32> -> vector<5x256xf32>
    %46 = vector.broadcast %22 : vector<1x256xf32> to vector<5x256xf32>
    %47 = arith.addf %45, %46 : vector<5x256xf32>
    %48 = vector.extract_strided_slice %19 {offsets = [5, 0, 0], sizes = [1, 5, 64], strides = [1, 1, 1]} : vector<8x5x64xf32> to vector<1x5x64xf32>
    %49 = vector.shape_cast %48 : vector<1x5x64xf32> to vector<5x64xf32>
    %cst_18 = arith.constant dense<0.000000e+00> : vector<5x256xf32>
    %50 = tpu.matmul %49, %20, %cst_18 {dimension_numbers = #tpu.dot_dimension_numbers<[1], [0], [0], [1], [0, 0, 1, 1], [], []>} : vector<5x64xf32>, vector<64x256xf32>, vector<5x256xf32> -> vector<5x256xf32>
    %51 = vector.broadcast %22 : vector<1x256xf32> to vector<5x256xf32>
    %52 = arith.addf %50, %51 : vector<5x256xf32>
    %53 = vector.extract_strided_slice %19 {offsets = [6, 0, 0], sizes = [1, 5, 64], strides = [1, 1, 1]} : vector<8x5x64xf32> to vector<1x5x64xf32>
    %54 = vector.shape_cast %53 : vector<1x5x64xf32> to vector<5x64xf32>
    %cst_19 = arith.constant dense<0.000000e+00> : vector<5x256xf32>
    %55 = tpu.matmul %54, %20, %cst_19 {dimension_numbers = #tpu.dot_dimension_numbers<[1], [0], [0], [1], [0, 0, 1, 1], [], []>} : vector<5x64xf32>, vector<64x256xf32>, vector<5x256xf32> -> vector<5x256xf32>
    %56 = vector.broadcast %22 : vector<1x256xf32> to vector<5x256xf32>
    %57 = arith.addf %55, %56 : vector<5x256xf32>
    %58 = vector.extract_strided_slice %19 {offsets = [7, 0, 0], sizes = [1, 5, 64], strides = [1, 1, 1]} : vector<8x5x64xf32> to vector<1x5x64xf32>
    %59 = vector.shape_cast %58 : vector<1x5x64xf32> to vector<5x64xf32>
    %cst_20 = arith.constant dense<0.000000e+00> : vector<5x256xf32>
    %60 = tpu.matmul %59, %20, %cst_20 {dimension_numbers = #tpu.dot_dimension_numbers<[1], [0], [0], [1], [0, 0, 1, 1], [], []>} : vector<5x64xf32>, vector<64x256xf32>, vector<5x256xf32> -> vector<5x256xf32>
    %61 = vector.broadcast %22 : vector<1x256xf32> to vector<5x256xf32>
    %62 = arith.addf %60, %61 : vector<5x256xf32>
    %cst_21 = arith.constant 0.000000e+00 : f32
    %63 = vector.broadcast %cst_21 : f32 to vector<5x64xf32>
    %cst_22 = arith.constant 0.000000e+00 : f32
    %64 = vector.broadcast %cst_22 : f32 to vector<5x64xf32>
    %cst_23 = arith.constant dense<0.000000e+00> : vector<5x256xf32>
    %65 = tpu.matmul %63, %21, %cst_23 {dimension_numbers = #tpu.dot_dimension_numbers<[1], [0], [0], [1], [0, 0, 1, 1], [], []>} : vector<5x64xf32>, vector<64x256xf32>, vector<5x256xf32> -> vector<5x256xf32>
    %66 = arith.addf %27, %65 : vector<5x256xf32>
    %67 = vector.extract_strided_slice %66 {offsets = [0, 0], sizes = [5, 192], strides = [1, 1]} : vector<5x256xf32> to vector<5x192xf32>
    %cst_24 = arith.constant 5.000000e-01 : f32
    %68 = vector.broadcast %cst_24 : f32 to vector<5x192xf32>
    %69 = arith.mulf %68, %67 : vector<5x192xf32>
    %70 = math.tanh %69 : vector<5x192xf32>
    %cst_25 = arith.constant 5.000000e-01 : f32
    %71 = vector.broadcast %cst_25 : f32 to vector<5x192xf32>
    %72 = arith.mulf %71, %70 : vector<5x192xf32>
    %cst_26 = arith.constant 5.000000e-01 : f32
    %73 = vector.broadcast %cst_26 : f32 to vector<5x192xf32>
    %74 = arith.addf %72, %73 : vector<5x192xf32>
    %75 = vector.extract_strided_slice %66 {offsets = [0, 192], sizes = [5, 64], strides = [1, 1]} : vector<5x256xf32> to vector<5x64xf32>
    %76 = math.tanh %75 : vector<5x64xf32>
    %77 = vector.extract_strided_slice %74 {offsets = [0, 0], sizes = [5, 64], strides = [1, 1]} : vector<5x192xf32> to vector<5x64xf32>
    %78 = vector.extract_strided_slice %74 {offsets = [0, 64], sizes = [5, 64], strides = [1, 1]} : vector<5x192xf32> to vector<5x64xf32>
    %79 = vector.extract_strided_slice %74 {offsets = [0, 128], sizes = [5, 64], strides = [1, 1]} : vector<5x192xf32> to vector<5x64xf32>
    %80 = arith.mulf %78, %64 : vector<5x64xf32>
    %81 = arith.mulf %77, %76 : vector<5x64xf32>
    %82 = arith.addf %80, %81 : vector<5x64xf32>
    %83 = math.tanh %82 : vector<5x64xf32>
    %84 = arith.mulf %79, %83 : vector<5x64xf32>
    %c0_27 = arith.constant 0 : index
    %c0_28 = arith.constant 0 : index
    %c0_29 = arith.constant 0 : index
    %85 = vector.load %arg6[%c0_27, %c0_28, %c0_29] : memref<8x5x64xf32, #tpu.memory_space<vmem>>, vector<1x5x64xf32>
    %86 = vector.shape_cast %85 : vector<1x5x64xf32> to vector<5x64xf32>
    %87 = vector.shape_cast %84 : vector<5x64xf32> to vector<1x5x64xf32>
    tpu.vector_store %arg6[%c0_27, %c0_28, %c0_29], %87 {strides = array<i32>} : memref<8x5x64xf32, #tpu.memory_space<vmem>>, vector<1x5x64xf32>,
    %cst_30 = arith.constant dense<0.000000e+00> : vector<5x256xf32>
    %88 = tpu.matmul %84, %21, %cst_30 {dimension_numbers = #tpu.dot_dimension_numbers<[1], [0], [0], [1], [0, 0, 1, 1], [], []>} : vector<5x64xf32>, vector<64x256xf32>, vector<5x256xf32> -> vector<5x256xf32>
    %89 = arith.addf %32, %88 : vector<5x256xf32>
    %90 = vector.extract_strided_slice %89 {offsets = [0, 0], sizes = [5, 192], strides = [1, 1]} : vector<5x256xf32> to vector<5x192xf32>
    %cst_31 = arith.constant 5.000000e-01 : f32
    %91 = vector.broadcast %cst_31 : f32 to vector<5x192xf32>
    %92 = arith.mulf %91, %90 : vector<5x192xf32>
    %93 = math.tanh %92 : vector<5x192xf32>
    %cst_32 = arith.constant 5.000000e-01 : f32
    %94 = vector.broadcast %cst_32 : f32 to vector<5x192xf32>
    %95 = arith.mulf %94, %93 : vector<5x192xf32>
    %cst_33 = arith.constant 5.000000e-01 : f32
    %96 = vector.broadcast %cst_33 : f32 to vector<5x192xf32>
    %97 = arith.addf %95, %96 : vector<5x192xf32>
    %98 = vector.extract_strided_slice %89 {offsets = [0, 192], sizes = [5, 64], strides = [1, 1]} : vector<5x256xf32> to vector<5x64xf32>
    %99 = math.tanh %98 : vector<5x64xf32>
    %100 = vector.extract_strided_slice %97 {offsets = [0, 0], sizes = [5, 64], strides = [1, 1]} : vector<5x192xf32> to vector<5x64xf32>
    %101 = vector.extract_strided_slice %97 {offsets = [0, 64], sizes = [5, 64], strides = [1, 1]} : vector<5x192xf32> to vector<5x64xf32>
    %102 = vector.extract_strided_slice %97 {offsets = [0, 128], sizes = [5, 64], strides = [1, 1]} : vector<5x192xf32> to vector<5x64xf32>
    %103 = arith.mulf %101, %82 : vector<5x64xf32>
    %104 = arith.mulf %100, %99 : vector<5x64xf32>
    %105 = arith.addf %103, %104 : vector<5x64xf32>
    %106 = math.tanh %105 : vector<5x64xf32>
    %107 = arith.mulf %102, %106 : vector<5x64xf32>
    %c1_34 = arith.constant 1 : index
    %c0_35 = arith.constant 0 : index
    %c0_36 = arith.constant 0 : index
    %108 = vector.load %arg6[%c1_34, %c0_35, %c0_36] : memref<8x5x64xf32, #tpu.memory_space<vmem>>, vector<1x5x64xf32>
    %109 = vector.shape_cast %108 : vector<1x5x64xf32> to vector<5x64xf32>
    %110 = vector.shape_cast %107 : vector<5x64xf32> to vector<1x5x64xf32>
    tpu.vector_store %arg6[%c1_34, %c0_35, %c0_36], %110 {strides = array<i32>} : memref<8x5x64xf32, #tpu.memory_space<vmem>>, vector<1x5x64xf32>,
    %cst_37 = arith.constant dense<0.000000e+00> : vector<5x256xf32>
    %111 = tpu.matmul %107, %21, %cst_37 {dimension_numbers = #tpu.dot_dimension_numbers<[1], [0], [0], [1], [0, 0, 1, 1], [], []>} : vector<5x64xf32>, vector<64x256xf32>, vector<5x256xf32> -> vector<5x256xf32>
    %112 = arith.addf %37, %111 : vector<5x256xf32>
    %113 = vector.extract_strided_slice %112 {offsets = [0, 0], sizes = [5, 192], strides = [1, 1]} : vector<5x256xf32> to vector<5x192xf32>
    %cst_38 = arith.constant 5.000000e-01 : f32
    %114 = vector.broadcast %cst_38 : f32 to vector<5x192xf32>
    %115 = arith.mulf %114, %113 : vector<5x192xf32>
    %116 = math.tanh %115 : vector<5x192xf32>
    %cst_39 = arith.constant 5.000000e-01 : f32
    %117 = vector.broadcast %cst_39 : f32 to vector<5x192xf32>
    %118 = arith.mulf %117, %116 : vector<5x192xf32>
    %cst_40 = arith.constant 5.000000e-01 : f32
    %119 = vector.broadcast %cst_40 : f32 to vector<5x192xf32>
    %120 = arith.addf %118, %119 : vector<5x192xf32>
    %121 = vector.extract_strided_slice %112 {offsets = [0, 192], sizes = [5, 64], strides = [1, 1]} : vector<5x256xf32> to vector<5x64xf32>
    %122 = math.tanh %121 : vector<5x64xf32>
    %123 = vector.extract_strided_slice %120 {offsets = [0, 0], sizes = [5, 64], strides = [1, 1]} : vector<5x192xf32> to vector<5x64xf32>
    %124 = vector.extract_strided_slice %120 {offsets = [0, 64], sizes = [5, 64], strides = [1, 1]} : vector<5x192xf32> to vector<5x64xf32>
    %125 = vector.extract_strided_slice %120 {offsets = [0, 128], sizes = [5, 64], strides = [1, 1]} : vector<5x192xf32> to vector<5x64xf32>
    %126 = arith.mulf %124, %105 : vector<5x64xf32>
    %127 = arith.mulf %123, %122 : vector<5x64xf32>
    %128 = arith.addf %126, %127 : vector<5x64xf32>
    %129 = math.tanh %128 : vector<5x64xf32>
    %130 = arith.mulf %125, %129 : vector<5x64xf32>
    %c2 = arith.constant 2 : index
    %c0_41 = arith.constant 0 : index
    %c0_42 = arith.constant 0 : index
    %131 = vector.load %arg6[%c2, %c0_41, %c0_42] : memref<8x5x64xf32, #tpu.memory_space<vmem>>, vector<1x5x64xf32>
    %132 = vector.shape_cast %131 : vector<1x5x64xf32> to vector<5x64xf32>
    %133 = vector.shape_cast %130 : vector<5x64xf32> to vector<1x5x64xf32>
    tpu.vector_store %arg6[%c2, %c0_41, %c0_42], %133 {strides = array<i32>} : memref<8x5x64xf32, #tpu.memory_space<vmem>>, vector<1x5x64xf32>,
    %cst_43 = arith.constant dense<0.000000e+00> : vector<5x256xf32>
    %134 = tpu.matmul %130, %21, %cst_43 {dimension_numbers = #tpu.dot_dimension_numbers<[1], [0], [0], [1], [0, 0, 1, 1], [], []>} : vector<5x64xf32>, vector<64x256xf32>, vector<5x256xf32> -> vector<5x256xf32>
    %135 = arith.addf %42, %134 : vector<5x256xf32>
    %136 = vector.extract_strided_slice %135 {offsets = [0, 0], sizes = [5, 192], strides = [1, 1]} : vector<5x256xf32> to vector<5x192xf32>
    %cst_44 = arith.constant 5.000000e-01 : f32
    %137 = vector.broadcast %cst_44 : f32 to vector<5x192xf32>
    %138 = arith.mulf %137, %136 : vector<5x192xf32>
    %139 = math.tanh %138 : vector<5x192xf32>
    %cst_45 = arith.constant 5.000000e-01 : f32
    %140 = vector.broadcast %cst_45 : f32 to vector<5x192xf32>
    %141 = arith.mulf %140, %139 : vector<5x192xf32>
    %cst_46 = arith.constant 5.000000e-01 : f32
    %142 = vector.broadcast %cst_46 : f32 to vector<5x192xf32>
    %143 = arith.addf %141, %142 : vector<5x192xf32>
    %144 = vector.extract_strided_slice %135 {offsets = [0, 192], sizes = [5, 64], strides = [1, 1]} : vector<5x256xf32> to vector<5x64xf32>
    %145 = math.tanh %144 : vector<5x64xf32>
    %146 = vector.extract_strided_slice %143 {offsets = [0, 0], sizes = [5, 64], strides = [1, 1]} : vector<5x192xf32> to vector<5x64xf32>
    %147 = vector.extract_strided_slice %143 {offsets = [0, 64], sizes = [5, 64], strides = [1, 1]} : vector<5x192xf32> to vector<5x64xf32>
    %148 = vector.extract_strided_slice %143 {offsets = [0, 128], sizes = [5, 64], strides = [1, 1]} : vector<5x192xf32> to vector<5x64xf32>
    %149 = arith.mulf %147, %128 : vector<5x64xf32>
    %150 = arith.mulf %146, %145 : vector<5x64xf32>
    %151 = arith.addf %149, %150 : vector<5x64xf32>
    %152 = math.tanh %151 : vector<5x64xf32>
    %153 = arith.mulf %148, %152 : vector<5x64xf32>
    %c3 = arith.constant 3 : index
    %c0_47 = arith.constant 0 : index
    %c0_48 = arith.constant 0 : index
    %154 = vector.load %arg6[%c3, %c0_47, %c0_48] : memref<8x5x64xf32, #tpu.memory_space<vmem>>, vector<1x5x64xf32>
    %155 = vector.shape_cast %154 : vector<1x5x64xf32> to vector<5x64xf32>
    %156 = vector.shape_cast %153 : vector<5x64xf32> to vector<1x5x64xf32>
    tpu.vector_store %arg6[%c3, %c0_47, %c0_48], %156 {strides = array<i32>} : memref<8x5x64xf32, #tpu.memory_space<vmem>>, vector<1x5x64xf32>,
    %cst_49 = arith.constant dense<0.000000e+00> : vector<5x256xf32>
    %157 = tpu.matmul %153, %21, %cst_49 {dimension_numbers = #tpu.dot_dimension_numbers<[1], [0], [0], [1], [0, 0, 1, 1], [], []>} : vector<5x64xf32>, vector<64x256xf32>, vector<5x256xf32> -> vector<5x256xf32>
    %158 = arith.addf %47, %157 : vector<5x256xf32>
    %159 = vector.extract_strided_slice %158 {offsets = [0, 0], sizes = [5, 192], strides = [1, 1]} : vector<5x256xf32> to vector<5x192xf32>
    %cst_50 = arith.constant 5.000000e-01 : f32
    %160 = vector.broadcast %cst_50 : f32 to vector<5x192xf32>
    %161 = arith.mulf %160, %159 : vector<5x192xf32>
    %162 = math.tanh %161 : vector<5x192xf32>
    %cst_51 = arith.constant 5.000000e-01 : f32
    %163 = vector.broadcast %cst_51 : f32 to vector<5x192xf32>
    %164 = arith.mulf %163, %162 : vector<5x192xf32>
    %cst_52 = arith.constant 5.000000e-01 : f32
    %165 = vector.broadcast %cst_52 : f32 to vector<5x192xf32>
    %166 = arith.addf %164, %165 : vector<5x192xf32>
    %167 = vector.extract_strided_slice %158 {offsets = [0, 192], sizes = [5, 64], strides = [1, 1]} : vector<5x256xf32> to vector<5x64xf32>
    %168 = math.tanh %167 : vector<5x64xf32>
    %169 = vector.extract_strided_slice %166 {offsets = [0, 0], sizes = [5, 64], strides = [1, 1]} : vector<5x192xf32> to vector<5x64xf32>
    %170 = vector.extract_strided_slice %166 {offsets = [0, 64], sizes = [5, 64], strides = [1, 1]} : vector<5x192xf32> to vector<5x64xf32>
    %171 = vector.extract_strided_slice %166 {offsets = [0, 128], sizes = [5, 64], strides = [1, 1]} : vector<5x192xf32> to vector<5x64xf32>
    %172 = arith.mulf %170, %151 : vector<5x64xf32>
    %173 = arith.mulf %169, %168 : vector<5x64xf32>
    %174 = arith.addf %172, %173 : vector<5x64xf32>
    %175 = math.tanh %174 : vector<5x64xf32>
    %176 = arith.mulf %171, %175 : vector<5x64xf32>
    %c4 = arith.constant 4 : index
    %c0_53 = arith.constant 0 : index
    %c0_54 = arith.constant 0 : index
    %177 = vector.load %arg6[%c4, %c0_53, %c0_54] : memref<8x5x64xf32, #tpu.memory_space<vmem>>, vector<1x5x64xf32>
    %178 = vector.shape_cast %177 : vector<1x5x64xf32> to vector<5x64xf32>
    %179 = vector.shape_cast %176 : vector<5x64xf32> to vector<1x5x64xf32>
    tpu.vector_store %arg6[%c4, %c0_53, %c0_54], %179 {strides = array<i32>} : memref<8x5x64xf32, #tpu.memory_space<vmem>>, vector<1x5x64xf32>,
    %cst_55 = arith.constant dense<0.000000e+00> : vector<5x256xf32>
    %180 = tpu.matmul %176, %21, %cst_55 {dimension_numbers = #tpu.dot_dimension_numbers<[1], [0], [0], [1], [0, 0, 1, 1], [], []>} : vector<5x64xf32>, vector<64x256xf32>, vector<5x256xf32> -> vector<5x256xf32>
    %181 = arith.addf %52, %180 : vector<5x256xf32>
    %182 = vector.extract_strided_slice %181 {offsets = [0, 0], sizes = [5, 192], strides = [1, 1]} : vector<5x256xf32> to vector<5x192xf32>
    %cst_56 = arith.constant 5.000000e-01 : f32
    %183 = vector.broadcast %cst_56 : f32 to vector<5x192xf32>
    %184 = arith.mulf %183, %182 : vector<5x192xf32>
    %185 = math.tanh %184 : vector<5x192xf32>
    %cst_57 = arith.constant 5.000000e-01 : f32
    %186 = vector.broadcast %cst_57 : f32 to vector<5x192xf32>
    %187 = arith.mulf %186, %185 : vector<5x192xf32>
    %cst_58 = arith.constant 5.000000e-01 : f32
    %188 = vector.broadcast %cst_58 : f32 to vector<5x192xf32>
    %189 = arith.addf %187, %188 : vector<5x192xf32>
    %190 = vector.extract_strided_slice %181 {offsets = [0, 192], sizes = [5, 64], strides = [1, 1]} : vector<5x256xf32> to vector<5x64xf32>
    %191 = math.tanh %190 : vector<5x64xf32>
    %192 = vector.extract_strided_slice %189 {offsets = [0, 0], sizes = [5, 64], strides = [1, 1]} : vector<5x192xf32> to vector<5x64xf32>
    %193 = vector.extract_strided_slice %189 {offsets = [0, 64], sizes = [5, 64], strides = [1, 1]} : vector<5x192xf32> to vector<5x64xf32>
    %194 = vector.extract_strided_slice %189 {offsets = [0, 128], sizes = [5, 64], strides = [1, 1]} : vector<5x192xf32> to vector<5x64xf32>
    %195 = arith.mulf %193, %174 : vector<5x64xf32>
    %196 = arith.mulf %192, %191 : vector<5x64xf32>
    %197 = arith.addf %195, %196 : vector<5x64xf32>
    %198 = math.tanh %197 : vector<5x64xf32>
    %199 = arith.mulf %194, %198 : vector<5x64xf32>
    %c5 = arith.constant 5 : index
    %c0_59 = arith.constant 0 : index
    %c0_60 = arith.constant 0 : index
    %200 = vector.load %arg6[%c5, %c0_59, %c0_60] : memref<8x5x64xf32, #tpu.memory_space<vmem>>, vector<1x5x64xf32>
    %201 = vector.shape_cast %200 : vector<1x5x64xf32> to vector<5x64xf32>
    %202 = vector.shape_cast %199 : vector<5x64xf32> to vector<1x5x64xf32>
    tpu.vector_store %arg6[%c5, %c0_59, %c0_60], %202 {strides = array<i32>} : memref<8x5x64xf32, #tpu.memory_space<vmem>>, vector<1x5x64xf32>,
    %cst_61 = arith.constant dense<0.000000e+00> : vector<5x256xf32>
    %203 = tpu.matmul %199, %21, %cst_61 {dimension_numbers = #tpu.dot_dimension_numbers<[1], [0], [0], [1], [0, 0, 1, 1], [], []>} : vector<5x64xf32>, vector<64x256xf32>, vector<5x256xf32> -> vector<5x256xf32>
    %204 = arith.addf %57, %203 : vector<5x256xf32>
    %205 = vector.extract_strided_slice %204 {offsets = [0, 0], sizes = [5, 192], strides = [1, 1]} : vector<5x256xf32> to vector<5x192xf32>
    %cst_62 = arith.constant 5.000000e-01 : f32
    %206 = vector.broadcast %cst_62 : f32 to vector<5x192xf32>
    %207 = arith.mulf %206, %205 : vector<5x192xf32>
    %208 = math.tanh %207 : vector<5x192xf32>
    %cst_63 = arith.constant 5.000000e-01 : f32
    %209 = vector.broadcast %cst_63 : f32 to vector<5x192xf32>
    %210 = arith.mulf %209, %208 : vector<5x192xf32>
    %cst_64 = arith.constant 5.000000e-01 : f32
    %211 = vector.broadcast %cst_64 : f32 to vector<5x192xf32>
    %212 = arith.addf %210, %211 : vector<5x192xf32>
    %213 = vector.extract_strided_slice %204 {offsets = [0, 192], sizes = [5, 64], strides = [1, 1]} : vector<5x256xf32> to vector<5x64xf32>
    %214 = math.tanh %213 : vector<5x64xf32>
    %215 = vector.extract_strided_slice %212 {offsets = [0, 0], sizes = [5, 64], strides = [1, 1]} : vector<5x192xf32> to vector<5x64xf32>
    %216 = vector.extract_strided_slice %212 {offsets = [0, 64], sizes = [5, 64], strides = [1, 1]} : vector<5x192xf32> to vector<5x64xf32>
    %217 = vector.extract_strided_slice %212 {offsets = [0, 128], sizes = [5, 64], strides = [1, 1]} : vector<5x192xf32> to vector<5x64xf32>
    %218 = arith.mulf %216, %197 : vector<5x64xf32>
    %219 = arith.mulf %215, %214 : vector<5x64xf32>
    %220 = arith.addf %218, %219 : vector<5x64xf32>
    %221 = math.tanh %220 : vector<5x64xf32>
    %222 = arith.mulf %217, %221 : vector<5x64xf32>
    %c6 = arith.constant 6 : index
    %c0_65 = arith.constant 0 : index
    %c0_66 = arith.constant 0 : index
    %223 = vector.load %arg6[%c6, %c0_65, %c0_66] : memref<8x5x64xf32, #tpu.memory_space<vmem>>, vector<1x5x64xf32>
    %224 = vector.shape_cast %223 : vector<1x5x64xf32> to vector<5x64xf32>
    %225 = vector.shape_cast %222 : vector<5x64xf32> to vector<1x5x64xf32>
    tpu.vector_store %arg6[%c6, %c0_65, %c0_66], %225 {strides = array<i32>} : memref<8x5x64xf32, #tpu.memory_space<vmem>>, vector<1x5x64xf32>,
    %cst_67 = arith.constant dense<0.000000e+00> : vector<5x256xf32>
    %226 = tpu.matmul %222, %21, %cst_67 {dimension_numbers = #tpu.dot_dimension_numbers<[1], [0], [0], [1], [0, 0, 1, 1], [], []>} : vector<5x64xf32>, vector<64x256xf32>, vector<5x256xf32> -> vector<5x256xf32>
    %227 = arith.addf %62, %226 : vector<5x256xf32>
    %228 = vector.extract_strided_slice %227 {offsets = [0, 0], sizes = [5, 192], strides = [1, 1]} : vector<5x256xf32> to vector<5x192xf32>
    %cst_68 = arith.constant 5.000000e-01 : f32
    %229 = vector.broadcast %cst_68 : f32 to vector<5x192xf32>
    %230 = arith.mulf %229, %228 : vector<5x192xf32>
    %231 = math.tanh %230 : vector<5x192xf32>
    %cst_69 = arith.constant 5.000000e-01 : f32
    %232 = vector.broadcast %cst_69 : f32 to vector<5x192xf32>
    %233 = arith.mulf %232, %231 : vector<5x192xf32>
    %cst_70 = arith.constant 5.000000e-01 : f32
    %234 = vector.broadcast %cst_70 : f32 to vector<5x192xf32>
    %235 = arith.addf %233, %234 : vector<5x192xf32>
    %236 = vector.extract_strided_slice %227 {offsets = [0, 192], sizes = [5, 64], strides = [1, 1]} : vector<5x256xf32> to vector<5x64xf32>
    %237 = math.tanh %236 : vector<5x64xf32>
    %238 = vector.extract_strided_slice %235 {offsets = [0, 0], sizes = [5, 64], strides = [1, 1]} : vector<5x192xf32> to vector<5x64xf32>
    %239 = vector.extract_strided_slice %235 {offsets = [0, 64], sizes = [5, 64], strides = [1, 1]} : vector<5x192xf32> to vector<5x64xf32>
    %240 = vector.extract_strided_slice %235 {offsets = [0, 128], sizes = [5, 64], strides = [1, 1]} : vector<5x192xf32> to vector<5x64xf32>
    %241 = arith.mulf %239, %220 : vector<5x64xf32>
    %242 = arith.mulf %238, %237 : vector<5x64xf32>
    %243 = arith.addf %241, %242 : vector<5x64xf32>
    %244 = math.tanh %243 : vector<5x64xf32>
    %245 = arith.mulf %240, %244 : vector<5x64xf32>
    %c7 = arith.constant 7 : index
    %c0_71 = arith.constant 0 : index
    %c0_72 = arith.constant 0 : index
    %246 = vector.load %arg6[%c7, %c0_71, %c0_72] : memref<8x5x64xf32, #tpu.memory_space<vmem>>, vector<1x5x64xf32>
    %247 = vector.shape_cast %246 : vector<1x5x64xf32> to vector<5x64xf32>
    %248 = vector.shape_cast %245 : vector<5x64xf32> to vector<1x5x64xf32>
    tpu.vector_store %arg6[%c7, %c0_71, %c0_72], %248 {strides = array<i32>} : memref<8x5x64xf32, #tpu.memory_space<vmem>>, vector<1x5x64xf32>,
    return
  }
}

</mosaic_0001>

<bundles_post_ra>
// kernel: tpu_custom_call.1
= control target key start
LH: loop header
LB: loop body
LE: loop exit
PB: predicated region body
PF: predicated region fallthrough
CT: control target
= control target key end

     0   :  { %11 = vsyncpa [#allocation3], 0  ;;  %s2403_s0 = inlined_call_operand.vmem [shape: f32[8,5,13], index: 0, kind: input, shape index: {}]   ;;  %s2404_s1 = inlined_call_operand.vmem [shape: f32[2,64], index: 1, kind: input, shape index: {}]   ;;  %s2405_s2 = inlined_call_operand.vmem [shape: f32[1,64], index: 2, kind: input, shape index: {}]   ;;  %s2406_s3 = inlined_call_operand.hbm [shape: f32[64,256], index: 3, kind: input, shape index: {}]   ;;  %s2407_s4 = inlined_call_operand.hbm [shape: f32[64,256], index: 4, kind: input, shape index: {}]   ;;  %s2408_s5 = inlined_call_operand.vmem [shape: f32[1,256], index: 5, kind: input, shape index: {}]   ;;  %s2409_s6 = inlined_call_operand.vmem [shape: f32[8,5,64], index: 6, kind: output, shape index: {}]  }
   0x1   :  { %12 = vsyncpa [#allocation5], 0  ;;  %s1812_s21 = smov [#allocation2]  }
   0x2   :  { %s24_s22 = sshll.u32 %s1812_s21, 4  ;;  %s25_s22 = int_to_ptr.vmem [resolvable:$true] %s24_s22 }
   0x3   :  { %s1776_s23 = scalar_lea.vmem %s25_s22, 2048  ;;  %p1781_p1 = scmp.lt.s32.totalorder %s25_s22, %s25_s22 }
   0x4   :  { %p1777_p0 = scmp.ne.s32.totalorder %s25_s22, %s1776_s23  ;;  %p1782_p2 = scmp.lt.s32.totalorder %s1776_s23, %s1776_s23 }
   0x6   :  { %p1783_p3 = por %p1782_p2, %p1781_p1 }
   0x8   :  { %p1784_p4 = pnand %p1783_p3, %p1777_p0 }
   0xa   :  { %1787 = shalt.err (!%p1784_p4)
}
   0xb   :  { %s1813_s24 = smov 256   ;;  %s1814_s25 = smov 16  }
   0xc   :  { %30 = dma.hbm_to_vmem [thread:$0]  %s2406_s3, 2048, %s25_s22, [#allocation3], %s1813_s24, %s1813_s24, %s1814_s25  }
   0xd   :  { %s1815_s28 = smov [#allocation4]  }
   0xe   :  { %s36_s29 = sshll.u32 %s1815_s28, 4  ;;  %s37_s29 = int_to_ptr.vmem [resolvable:$true] %s36_s29 }
   0xf   :  { %s1796_s30 = scalar_lea.vmem %s37_s29, 2048  ;;  %p1801_p6 = scmp.lt.s32.totalorder %s37_s29, %s37_s29 }
  0x10   :  { %p1797_p5 = scmp.ne.s32.totalorder %s37_s29, %s1796_s30  ;;  %p1802_p7 = scmp.lt.s32.totalorder %s1796_s30, %s1796_s30 }
  0x12   :  { %p1803_p8 = por %p1802_p7, %p1801_p6 }
  0x14   :  { %p1804_p9 = pnand %p1803_p8, %p1797_p5 }
  0x16   :  { %1807 = shalt.err (!%p1804_p9)
}
  0x17   :  { %42 = dma.hbm_to_vmem [thread:$0]  %s2407_s4, 2048, %s37_s29, [#allocation5], %s1813_s24, %s1813_s24, %s1814_s25  }
  0x18   :  { %1808 = dma.done.wait [#allocation3], 2048  }
  0x19   :  { %1809 = vsyncadd [#allocation3], 4294965248 }
  0x1a   :  { %1810 = dma.done.wait [#allocation5], 2048  }
  0x1b   :  { %1811 = vsyncadd [#allocation5], 4294965248  ;;  %v1816_v0 = vmov 6   ;;  %v53_v1 = vld [vmem:[%s2403_s0 + $0x10] sm:$0x1f]  ;;  %v1867_v3 = vld [vmem:[#allocation2 + $0x78] sm:$0xff] }
  0x1c   :  { %1698 = vset.pattern.permute.xlu1 %v1816_v0  ;;  %1696 = vset.pattern.permute.xlu0 %v1816_v0  ;;  %v51_v2 = vld [vmem:[%s2403_s0] sm:$0x1f]  ;;  %v1869_v4 = vld [vmem:[#allocation2 + $0x70] sm:$0xff]  ;;  %v1872_v5 = vld [vmem:[#allocation2 + $0x68] sm:$0xff]  ;;  %v1817_v7 = vmov 7   ;;  %v1818_v13 = vmov 0.0  }
  0x1d   :  { %72 = vperm.xlu1 %1698, %v53_v1   ;;  %62 = vperm.xlu0 %1696, %v51_v2   ;;  %v1878_v6 = vld [vmem:[#allocation2 + $0x60] sm:$0xff]  ;;  %v1883_v8 = vld [vmem:[#allocation2 + $0x58] sm:$0xff]  ;;  %v1885_v9 = vld [vmem:[#allocation2 + $0x50] sm:$0xff]  ;;  %vm232_vm0 = vcmask 523264   ;;  %s1819_s28 = smov 64   ;;  %vm927_vm1 = vcmask 520192  }
  0x1e   :  { %252 = vmatprep.subr.mxu0 %v1867_v3  ;;  %326 = vmatprep.subr.mxu1 %v1867_v3  ;;  %v55_v10 = vld [vmem:[%s2403_s0 + $0x20] sm:$0x1f]  ;;  %v1893_v11 = vld [vmem:[#allocation2 + $0x48] sm:$0xff]  ;;  %v1900_v14 = vld [vmem:[#allocation2 + $0x38] sm:$0xff] }
  0x1f   :  { %253 = vmatpush1.msra.mxu0 %v1869_v4  ;;  %327 = vmatpush1.msra.mxu1 %v1869_v4  ;;  %v1897_v12 = vld [vmem:[#allocation2 + $0x40] sm:$0xff]  ;;  %v57_v15 = vld [vmem:[%s2403_s0 + $0x30] sm:$0x1f]  ;;  %v1909_v17 = vld [vmem:[#allocation2 + $0x28] sm:$0xff] }
  0x20   :  { %254 = vmatprep.subr.mxu0 %v1872_v5  ;;  %328 = vmatprep.subr.mxu1 %v1872_v5  ;;  %v1906_v16 = vld [vmem:[#allocation2 + $0x30] sm:$0xff]  ;;  %v1913_v18 = vld [vmem:[#allocation2 + $0x20] sm:$0xff]  ;;  %v1917_v19 = vld [vmem:[#allocation2 + $0x18] sm:$0xff] }
  0x21   :  { %1699 = vset.pattern.permute.xlu1 %v1817_v7  ;;  %1697 = vset.pattern.permute.xlu0 %v1817_v7  ;;  %v1920_v20 = vld [vmem:[#allocation2 + $0x10] sm:$0xff]  ;;  %v1923_v21 = vld [vmem:[#allocation2 + $0x8] sm:$0xff]  ;;  %v1927_v22 = vld [vmem:[#allocation2] sm:$0xff] }
  0x22   :  { %122 = vperm.xlu1 %1699, %v53_v1   ;;  %114 = vperm.xlu0 %1697, %v51_v2   ;;  %v1947_v24 = vld [vmem:[%s2404_s1] ss:$0 sm:$0xff]  ;;  %v1952_v25 = vld [vmem:[%s2404_s1 + $0x1] ss:$0 sm:$0xff]  ;;  %v2022_v53 = vld [vmem:[#allocation4 + $0x78] sm:$0xff] }
  0x23   :  { %255 = vmatpush1.msra.mxu0 %v1878_v6  ;;  %329 = vmatpush1.msra.mxu1 %v1878_v6  ;;  %v1959_v29 = vld [vmem:[%s2405_s2] ss:$0 sm:$0xff]  ;;  %v2025_v55 = vld [vmem:[#allocation4 + $0x70] sm:$0xff]  ;;  %v2028_v56 = vld [vmem:[#allocation4 + $0x68] sm:$0xff] }
  0x24   :  { %256 = vmatprep.subr.mxu0 %v1883_v8  ;;  %330 = vmatprep.subr.mxu1 %v1883_v8  ;;  %v2032_v57 = vld [vmem:[#allocation4 + $0x60] sm:$0xff]  ;;  %v2035_v58 = vld [vmem:[#allocation4 + $0x58] sm:$0xff]  ;;  %v2039_v59 = vld [vmem:[#allocation4 + $0x50] sm:$0xff] }
  0x25   :  { %257 = vmatpush1.msra.mxu0 %v1885_v9  ;;  %300 = vmatprep.mubr.f32.mxu0 %v1818_v13  ;;  %v2042_v60 = vld [vmem:[#allocation4 + $0x48] sm:$0xff]  ;;  %v2045_v61 = vld [vmem:[#allocation4 + $0x40] sm:$0xff]  ;;  %v2048_v62 = vld [vmem:[#allocation4 + $0x38] sm:$0xff] }
  0x26   :  { %1700 = vset.pattern.permute.xlu1 %v1816_v0  ;;  %130 = vperm.xlu0 %1697, %v55_v10   ;;  %v2051_v63 = vld [vmem:[#allocation4 + $0x30] sm:$0xff]  ;;  %v2057_v1 = vld [vmem:[#allocation4 + $0x20] sm:$0xff]  ;;  %v2060_v2 = vld [vmem:[#allocation4 + $0x18] sm:$0xff] }
  0x27   :  { %82 = vperm.xlu1 %1700, %v55_v10   ;;  %258 = vmatprep.subr.mxu0 %v1893_v11  ;;  %v2063_v10 = vld [vmem:[#allocation4 + $0x10] sm:$0xff] }
  0x28   :  { %259 = vmatpush1.msra.mxu0 %v1897_v12  ;;  %331 = vmatpush1.msra.mxu1 %v1885_v9 }
  0x29   :  { %260 = vmatprep.subr.mxu0 %v1900_v14  ;;  %332 = vmatprep.subr.mxu1 %v1893_v11 }
  0x2a   :  { %138 = vperm.xlu0 %1697, %v57_v15   ;;  %261 = vmatpush1.msra.mxu0 %v1906_v16 }
  0x2b   :  { %92 = vperm.xlu1 %1700, %v57_v15   ;;  %262 = vmatprep.subr.mxu0 %v1909_v17  ;;  %v2066_v15 = vld [vmem:[#allocation4 + $0x8] sm:$0xff] }
  0x2c   :  { %263 = vmatpush1.msra.mxu0 %v1913_v18  ;;  %333 = vmatpush1.msra.mxu1 %v1897_v12 }
  0x2d   :  { %264 = vmatprep.subr.mxu0 %v1917_v19  ;;  %334 = vmatprep.subr.mxu1 %v1900_v14 }
  0x2e   :  { %265 = vmatpush1.msra.mxu0 %v1920_v20  ;;  %1701 = vset.pattern.permute.xlu0 %v1816_v0  ;;  %v2054_v0 = vld [vmem:[#allocation4 + $0x28] sm:$0xff] }
  0x2f   :  { %266 = vmatprep.subr.mxu0 %v1923_v21  ;;  %1702 = vset.pattern.permute.xlu1 %v1817_v7 }
  0x30   :  { %267 = vmatpush1.msra.mxu0 %v1927_v22  ;;  %335 = vmatpush1.msra.mxu1 %v1906_v16 }
  0x31   :  { %400 = vmatprep.subr.mxu0 %v1867_v3  ;;  %336 = vmatprep.subr.mxu1 %v1909_v17 }
  0x32   :  { %337 = vmatpush1.msra.mxu1 %v1913_v18  ;;  %374 = vmatprep.mubr.f32.mxu1 %v1818_v13 }
  0x33   :  { %338 = vmatprep.subr.mxu1 %v1917_v19 }
  0x34   :  { %339 = vmatpush1.msra.mxu1 %v1920_v20 }
  0x35   :  { %340 = vmatprep.subr.mxu1 %v1923_v21 }
  0x36   :  { %341 = vmatpush1.msra.mxu1 %v1927_v22 }
  0x37   :  { %474 = vmatprep.subr.mxu1 %v1867_v3 }
  0x98   :  { %v63_v23 = vpop.permute.xlu0 %62  ;;  %v73_v31 = vpop.permute.xlu1 %72 }
  0x99   :  { %v104_v27 = vmul.f32 %v1947_v24, %v63_v23  ;;  %v106_v35 = vmul.f32 %v1947_v24, %v73_v31  ;;  %v2069_v23 = vld [vmem:[#allocation4] sm:$0xff]  ;;  %v222_v31 = vlaneseq }
  0x9d   :  { %v115_v26 = vpop.permute.xlu0 %114  ;;  %v123_v34 = vpop.permute.xlu1 %122 }
  0x9e   :  { %v149_v28 = vmul.f32 %v1952_v25, %v115_v26  ;;  %v151_v36 = vmul.f32 %v1952_v25, %v123_v34  ;;  %v52_v26 = vld [vmem:[%s2403_s0 + $0x8] sm:$0x1f] }
  0x9f   :  { %67 = vperm.xlu0 %1701, %v52_v26  }
  0xa0   :  { %v157_v30 = vadd.f32 %v149_v28, %v104_v27  ;;  %v159_v37 = vadd.f32 %v151_v36, %v106_v35  ;;  %v220_v36 = vld [vmem:[%s2408_s5] sm:$0x3] }
  0xa1   :  { %v131_v40 = vpop.permute.xlu0 %130 }
  0xa2   :  { %v172_v32 = vadd.f32 %v1959_v29, %v157_v30  ;;  %v174_v38 = vadd.f32 %v1959_v29, %v159_v37  ;;  %v83_v41 = vpop.permute.xlu1 %82  ;;  %v153_v42 = vmul.f32 %v1952_v25, %v131_v40 }
  0xa3   :  { %v108_v43 = vmul.f32 %v1947_v24, %v83_v41 }
  0xa4   :  { %v180_v33 = vmax.f32 %v172_v32, 0.0  ;;  %v182_v39 = vmax.f32 %v174_v38, 0.0 }
  0xa5   :  { %v161_v44 = vadd.f32 %v153_v42, %v108_v43  ;;  %v139_v47 = vpop.permute.xlu0 %138 }
  0xa6   :  { %1666 = vmatmul.mubr.msk.f32.vlgmr.msra.gmra.mxu0 %vm232_vm0, %v180_v33  ;;  %v93_v48 = vpop.permute.xlu1 %92  ;;  %v155_v49 = vmul.f32 %v1952_v25, %v139_v47  ;;  %v223_v33 = vshrl.u32 %v222_v31, 7 }
  0xa7   :  { %401 = vmatpush1.msra.mxu0 %v1869_v4  ;;  %448 = vmatprep.mubr.f32.mxu0 %v1818_v13  ;;  %v176_v45 = vadd.f32 %v1959_v29, %v161_v44  ;;  %v110_v50 = vmul.f32 %v1947_v24, %v93_v48 }
  0xa8   :  { %402 = vmatprep.subr.mxu0 %v1872_v5  ;;  %v224_v35 = vsub.s32 0, %v223_v33  ;;  %v228_v38 = vsub.s32 1, %v223_v33 }
  0xa9   :  { %403 = vmatpush1.msra.mxu0 %v1878_v6  ;;  %v184_v46 = vmax.f32 %v176_v45, 0.0  ;;  %v163_v51 = vadd.f32 %v155_v49, %v110_v50  ;;  %v54_v49 = vld [vmem:[%s2403_s0 + $0x18] sm:$0x1f]  ;;  %v56_v50 = vld [vmem:[%s2403_s0 + $0x28] sm:$0x1f] }
  0xaa   :  { %404 = vmatprep.subr.mxu0 %v1883_v8  ;;  %v2109_v40 = vrot.slane %v220_v36, %v224_v35  ;;  %v2111_v41 = vrot.slane %v220_v36, %v228_v38  ;;  %77 = vperm.xlu0 %1701, %v54_v49  }
  0xab   :  { %405 = vmatpush1.msra.mxu0 %v1885_v9  ;;  %v178_v52 = vadd.f32 %v1959_v29, %v163_v51  ;;  %v58_v51 = vld [vmem:[%s2403_s0 + $0x38] sm:$0x1f] }
  0xac   :  { %406 = vmatprep.subr.mxu0 %v1893_v11 }
  0xad   :  { %407 = vmatpush1.msra.mxu0 %v1897_v12  ;;  %v186_v54 = vmax.f32 %v178_v52, 0.0 }
  0xae   :  { %408 = vmatprep.subr.mxu0 %v1900_v14  ;;  %87 = vperm.xlu0 %1701, %v56_v50  }
  0xaf   :  { %409 = vmatpush1.msra.mxu0 %v1906_v16 }
  0xb0   :  { %410 = vmatprep.subr.mxu0 %v1909_v17 }
  0xb1   :  { %411 = vmatpush1.msra.mxu0 %v1913_v18 }
  0xb2   :  { %412 = vmatprep.subr.mxu0 %v1917_v19  ;;  %97 = vperm.xlu0 %1701, %v58_v51  }
  0xb3   :  { %413 = vmatpush1.msra.mxu0 %v1920_v20 }
  0xb4   :  { %414 = vmatprep.subr.mxu0 %v1923_v21 }
  0xb5   :  { %415 = vmatpush1.msra.mxu0 %v1927_v22 }
  0xb6   :  { %1668 = vmatmul.mubr.msk.f32.vlgmr.msra.gmra.mxu0 %vm232_vm0, %v182_v39  ;;  %548 = vmatprep.subr.mxu0 %v1867_v3 }
  0xb7   :  { %549 = vmatpush1.msra.mxu0 %v1869_v4  ;;  %596 = vmatprep.mubr.f32.mxu0 %v1818_v13 }
  0xb8   :  { %550 = vmatprep.subr.mxu0 %v1872_v5  ;;  %1703 = vset.pattern.permute.xlu0 %v1817_v7 }
  0xb9   :  { %551 = vmatpush1.msra.mxu0 %v1878_v6 }
  0xba   :  { %552 = vmatprep.subr.mxu0 %v1883_v8 }
  0xbb   :  { %553 = vmatpush1.msra.mxu0 %v1885_v9 }
  0xbc   :  { %554 = vmatprep.subr.mxu0 %v1893_v11 }
  0xbd   :  { %555 = vmatpush1.msra.mxu0 %v1897_v12 }
  0xbe   :  { %556 = vmatprep.subr.mxu0 %v1900_v14 }
  0xbf   :  { %557 = vmatpush1.msra.mxu0 %v1906_v16 }
  0xc0   :  { %558 = vmatprep.subr.mxu0 %v1909_v17 }
  0xc1   :  { %559 = vmatpush1.msra.mxu0 %v1913_v18 }
  0xc2   :  { %560 = vmatprep.subr.mxu0 %v1917_v19 }
  0xc3   :  { %561 = vmatpush1.msra.mxu0 %v1920_v20 }
  0xc4   :  { %562 = vmatprep.subr.mxu0 %v1923_v21 }
  0xc5   :  { %563 = vmatpush1.msra.mxu0 %v1927_v22 }
  0xc6   :  { %1670 = vmatmul.mubr.msk.f32.vlgmr.msra.gmra.mxu0 %vm232_vm0, %v184_v46  ;;  %696 = vmatprep.subr.mxu0 %v1867_v3 }
  0xc7   :  { %697 = vmatpush1.msra.mxu0 %v1869_v4  ;;  %744 = vmatprep.mubr.f32.mxu0 %v1818_v13 }
  0xc8   :  { %698 = vmatprep.subr.mxu0 %v1872_v5 }
  0xc9   :  { %699 = vmatpush1.msra.mxu0 %v1878_v6 }
  0xca   :  { %700 = vmatprep.subr.mxu0 %v1883_v8 }
  0xcb   :  { %701 = vmatpush1.msra.mxu0 %v1885_v9 }
  0xcc   :  { %702 = vmatprep.subr.mxu0 %v1893_v11 }
  0xcd   :  { %703 = vmatpush1.msra.mxu0 %v1897_v12 }
  0xce   :  { %704 = vmatprep.subr.mxu0 %v1900_v14 }
  0xcf   :  { %705 = vmatpush1.msra.mxu0 %v1906_v16 }
  0xd0   :  { %706 = vmatprep.subr.mxu0 %v1909_v17 }
  0xd1   :  { %707 = vmatpush1.msra.mxu0 %v1913_v18 }
  0xd2   :  { %708 = vmatprep.subr.mxu0 %v1917_v19 }
  0xd3   :  { %709 = vmatpush1.msra.mxu0 %v1920_v20 }
  0xd4   :  { %710 = vmatprep.subr.mxu0 %v1923_v21 }
  0xd5   :  { %711 = vmatpush1.msra.mxu0 %v1927_v22 }
  0xd6   :  { %1672 = vmatmul.mubr.msk.f32.vlgmr.msra.gmra.mxu0 %vm232_vm0, %v186_v54  ;;  %844 = vmatprep.subr.mxu0 %v2022_v53 }
  0xd7   :  { %845 = vmatpush1.msra.mxu0 %v2025_v55  ;;  %892 = vmatprep.mubr.f32.mxu0 %v1818_v13 }
  0xd8   :  { %846 = vmatprep.subr.mxu0 %v2028_v56 }
  0xd9   :  { %847 = vmatpush1.msra.mxu0 %v2032_v57 }
  0xda   :  { %848 = vmatprep.subr.mxu0 %v2035_v58 }
  0xdb   :  { %849 = vmatpush1.msra.mxu0 %v2039_v59 }
  0xdc   :  { %850 = vmatprep.subr.mxu0 %v2042_v60 }
  0xdd   :  { %851 = vmatpush1.msra.mxu0 %v2045_v61 }
  0xde   :  { %852 = vmatprep.subr.mxu0 %v2048_v62 }
  0xdf   :  { %853 = vmatpush1.msra.mxu0 %v2051_v63 }
  0xe0   :  { %854 = vmatprep.subr.mxu0 %v2054_v0 }
  0xe1   :  { %855 = vmatpush1.msra.mxu0 %v2057_v1 }
  0xe2   :  { %856 = vmatprep.subr.mxu0 %v2060_v2 }
  0xe3   :  { %857 = vmatpush1.msra.mxu0 %v2063_v10 }
  0xe4   :  { %858 = vmatprep.subr.mxu0 %v2066_v15 }
  0xe5   :  { %859 = vmatpush1.msra.mxu0 %v2069_v23 }
  0xe6   :  { %893 = vmatmul.mubr.f32.vlgmr.msra.gmra.mxu0 %v1818_v13  ;;  %1052 = vmatprep.subr.mxu0 %v2022_v53 }
  0xe7   :  { %1053 = vmatpush1.msra.mxu0 %v2025_v55  ;;  %1100 = vmatprep.mubr.f32.mxu0 %v1818_v13 }
  0xe8   :  { %1054 = vmatprep.subr.mxu0 %v2028_v56 }
  0xe9   :  { %1055 = vmatpush1.msra.mxu0 %v2032_v57 }
  0xea   :  { %1056 = vmatprep.subr.mxu0 %v2035_v58 }
  0xeb   :  { %1057 = vmatpush1.msra.mxu0 %v2039_v59 }
  0xec   :  { %1058 = vmatprep.subr.mxu0 %v2042_v60 }
  0xed   :  { %1059 = vmatpush1.msra.mxu0 %v2045_v61 }
  0xee   :  { %1060 = vmatprep.subr.mxu0 %v2048_v62 }
  0xef   :  { %1061 = vmatpush1.msra.mxu0 %v2051_v63 }
  0xf0   :  { %1062 = vmatprep.subr.mxu0 %v2054_v0 }
  0xf1   :  { %1063 = vmatpush1.msra.mxu0 %v2057_v1 }
  0xf2   :  { %1064 = vmatprep.subr.mxu0 %v2060_v2 }
  0xf3   :  { %1065 = vmatpush1.msra.mxu0 %v2063_v10 }
  0xf4   :  { %1066 = vmatprep.subr.mxu0 %v2066_v15 }
  0xf5   :  { %1067 = vmatpush1.msra.mxu0 %v2069_v23 }
  0xf6   :  { %1260 = vmatprep.subr.mxu0 %v2022_v53 }
 0x11a   :  { %v68_v36 = vpop.permute.xlu0 %67 }
 0x11b   :  { %v105_v38 = vmul.f32 %v1947_v24, %v68_v36 }
 0x166   :  { %v302_v27 = vpop.f32.mrf.mxu0 }
 0x167   :  { %v303_v43 = vadd.f32 %v302_v27, %v2109_v40 }
 0x168   :  { %v304_v28 = vpop.f32.mrf.mxu0 }
 0x169   :  { %v305_v45 = vadd.f32 %v304_v28, %v2111_v41 }
 0x176   :  { %v2096_v30 = vpop.f32.mrf.mxu0 }
 0x178   :  { %v2098_v32 = vpop.f32.mrf.mxu0 }
 0x186   :  { %v2100_v34 = vpop.f32.mrf.mxu0 }
 0x188   :  { %v2105_v37 = vpop.f32.mrf.mxu0 }
 0x196   :  { %v2107_v39 = vpop.f32.mrf.mxu0 }
 0x198   :  { %v2113_v42 = vpop.f32.mrf.mxu0 }
 0x1a6   :  { %v894_v44 = vpop.f32.mrf.mxu0 }
 0x1a7   :  { %v899_v46 = vadd.f32 %v894_v44, %v303_v43 }
 0x1a8   :  { %v896_v47 = vpop.f32.mrf.mxu0 }
 0x1a9   :  { %v2117_v48 = vadd.f32 %v896_v47, %v305_v45  ;;  %v901_v54 = vmul.f32 0.5, %v899_v46 }
 0x1ab   :  { %1704 = vtanh.f32 %v2117_v48 }
 0x1ac   :  { %1706 = vtanh.f32 %v901_v54 }
 0x1b8   :  { %v1705_v52 = vpop.eup %1704 }
 0x1b9   :  { %912 = vrot.lane.b32.xlu1 %v1705_v52, %s1819_s28  ;;  %v1707_v27 = vpop.eup %1706 }
 0x1ba   :  { %v905_v28 = vmul.f32 0.5, %v1707_v27 }
 0x1bc   :  { %v907_v31 = vadd.f32 0.5, %v905_v28 }
 0x1bd   :  { %118 = vperm.xlu1 %1702, %v52_v26  }
 0x1be   :  { %v910_v46 = vmul.f32 0.0, %v907_v31 }
 0x22b   :  { %v913_v33 = vpop.permute.xlu1 %912 }
 0x22c   :  { %v915_v35 = vmul.f32 %v913_v33, %v907_v31 }
 0x22e   :  { %917 = vrot.lane.b32.xlu1 %v915_v35, %s1819_s28 }
 0x232   :  { %126 = vperm.xlu1 %1702, %v54_v49  }
 0x236   :  { %134 = vperm.xlu1 %1702, %v56_v50   ;;  %v78_v50 = vpop.permute.xlu0 %77 }
 0x238   :  { %v119_v43 = vpop.permute.xlu1 %118 }
 0x239   :  { %v150_v44 = vmul.f32 %v1952_v25, %v119_v43 }
 0x23a   :  { %142 = vperm.xlu1 %1702, %v58_v51   ;;  %v107_v51 = vmul.f32 %v1947_v24, %v78_v50  ;;  %v88_v31 = vpop.permute.xlu0 %87 }
 0x23b   :  { %v158_v7 = vadd.f32 %v150_v44, %v105_v38  ;;  %v109_v43 = vmul.f32 %v1947_v24, %v88_v31 }
 0x23d   :  { %v173_v26 = vadd.f32 %v1959_v29, %v158_v7 }
 0x23f   :  { %v181_v45 = vmax.f32 %v173_v26, 0.0 }
 0x241   :  { %1667 = vmatmul.mubr.msk.f32.vlgmr.msra.gmra.mxu1 %vm232_vm0, %v181_v45 }
 0x242   :  { %475 = vmatpush1.msra.mxu1 %v1869_v4  ;;  %522 = vmatprep.mubr.f32.mxu1 %v1818_v13 }
 0x243   :  { %476 = vmatprep.subr.mxu1 %v1872_v5 }
 0x244   :  { %477 = vmatpush1.msra.mxu1 %v1878_v6 }
 0x245   :  { %478 = vmatprep.subr.mxu1 %v1883_v8 }
 0x246   :  { %479 = vmatpush1.msra.mxu1 %v1885_v9 }
 0x247   :  { %480 = vmatprep.subr.mxu1 %v1893_v11 }
 0x248   :  { %481 = vmatpush1.msra.mxu1 %v1897_v12 }
 0x249   :  { %482 = vmatprep.subr.mxu1 %v1900_v14 }
 0x24a   :  { %483 = vmatpush1.msra.mxu1 %v1906_v16 }
 0x24b   :  { %484 = vmatprep.subr.mxu1 %v1909_v17 }
 0x24c   :  { %485 = vmatpush1.msra.mxu1 %v1913_v18 }
 0x24d   :  { %486 = vmatprep.subr.mxu1 %v1917_v19 }
 0x24e   :  { %487 = vmatpush1.msra.mxu1 %v1920_v20 }
 0x24f   :  { %488 = vmatprep.subr.mxu1 %v1923_v21 }
 0x250   :  { %489 = vmatpush1.msra.mxu1 %v1927_v22 }
 0x251   :  { %622 = vmatprep.subr.mxu1 %v1867_v3 }
 0x2a0   :  { %v918_v47 = vpop.permute.xlu1 %917 }
 0x2a1   :  { %v2153_v49 = vadd.f32 %v918_v47, %v910_v46  ;;  %v98_v46 = vpop.permute.xlu0 %97 }
 0x2a2   :  { %v111_v50 = vmul.f32 %v1947_v24, %v98_v46 }
 0x2a3   :  { %1708 = vtanh.f32 %v2153_v49 }
 0x2ad   :  { %v127_v52 = vpop.permute.xlu1 %126 }
 0x2ae   :  { %v152_v54 = vmul.f32 %v1952_v25, %v127_v52 }
 0x2b0   :  { %v1709_v27 = vpop.eup %1708  ;;  %v160_v28 = vadd.f32 %v152_v54, %v107_v51 }
 0x2b1   :  { %923 = vrot.lane.b32.xlu0 %v1709_v27, %s1819_s28  ;;  %v135_v36 = vpop.permute.xlu1 %134 }
 0x2b2   :  { %v175_v33 = vadd.f32 %v1959_v29, %v160_v28  ;;  %v154_v38 = vmul.f32 %v1952_v25, %v135_v36 }
 0x2b4   :  { %v183_v35 = vmax.f32 %v175_v33, 0.0  ;;  %v162_v44 = vadd.f32 %v154_v38, %v109_v43 }
 0x2b5   :  { %v143_v45 = vpop.permute.xlu1 %142 }
 0x2b6   :  { %1669 = vmatmul.mubr.msk.f32.vlgmr.msra.gmra.mxu1 %vm232_vm0, %v183_v35  ;;  %v177_v7 = vadd.f32 %v1959_v29, %v162_v44  ;;  %v156_v47 = vmul.f32 %v1952_v25, %v143_v45 }
 0x2b7   :  { %623 = vmatpush1.msra.mxu1 %v1869_v4  ;;  %670 = vmatprep.mubr.f32.mxu1 %v1818_v13 }
 0x2b8   :  { %624 = vmatprep.subr.mxu1 %v1872_v5  ;;  %v185_v26 = vmax.f32 %v177_v7, 0.0  ;;  %v164_v51 = vadd.f32 %v156_v47, %v111_v50 }
 0x2b9   :  { %625 = vmatpush1.msra.mxu1 %v1878_v6 }
 0x2ba   :  { %626 = vmatprep.subr.mxu1 %v1883_v8 }
 0x2bb   :  { %627 = vmatpush1.msra.mxu1 %v1885_v9 }
 0x2bc   :  { %628 = vmatprep.subr.mxu1 %v1893_v11 }
 0x2bd   :  { %629 = vmatpush1.msra.mxu1 %v1897_v12 }
 0x2be   :  { %630 = vmatprep.subr.mxu1 %v1900_v14 }
 0x2bf   :  { %631 = vmatpush1.msra.mxu1 %v1906_v16 }
 0x2c0   :  { %632 = vmatprep.subr.mxu1 %v1909_v17 }
 0x2c1   :  { %633 = vmatpush1.msra.mxu1 %v1913_v18 }
 0x2c2   :  { %634 = vmatprep.subr.mxu1 %v1917_v19 }
 0x2c3   :  { %635 = vmatpush1.msra.mxu1 %v1920_v20 }
 0x2c4   :  { %636 = vmatprep.subr.mxu1 %v1923_v21 }
 0x2c5   :  { %637 = vmatpush1.msra.mxu1 %v1927_v22 }
 0x2c6   :  { %1671 = vmatmul.mubr.msk.f32.vlgmr.msra.gmra.mxu1 %vm232_vm0, %v185_v26  ;;  %770 = vmatprep.subr.mxu1 %v1867_v3  ;;  %v179_v3 = vadd.f32 %v1959_v29, %v164_v51 }
 0x2c7   :  { %771 = vmatpush1.msra.mxu1 %v1869_v4  ;;  %818 = vmatprep.mubr.f32.mxu1 %v1818_v13 }
 0x2c8   :  { %772 = vmatprep.subr.mxu1 %v1872_v5  ;;  %v187_v4 = vmax.f32 %v179_v3, 0.0  ;;  %v902_v5 = vmul.f32 0.5, %v2117_v48 }
 0x2c9   :  { %773 = vmatpush1.msra.mxu1 %v1878_v6 }
 0x2ca   :  { %774 = vmatprep.subr.mxu1 %v1883_v8  ;;  %1710 = vtanh.f32 %v902_v5  ;;  %v453_v5 = vadd.f32 %v2098_v32, %v2111_v41 }
 0x2cb   :  { %775 = vmatpush1.msra.mxu1 %v1885_v9 }
 0x2cc   :  { %776 = vmatprep.subr.mxu1 %v1893_v11 }
 0x2cd   :  { %777 = vmatpush1.msra.mxu1 %v1897_v12 }
 0x2ce   :  { %778 = vmatprep.subr.mxu1 %v1900_v14 }
 0x2cf   :  { %779 = vmatpush1.msra.mxu1 %v1906_v16 }
 0x2d0   :  { %780 = vmatprep.subr.mxu1 %v1909_v17 }
 0x2d1   :  { %781 = vmatpush1.msra.mxu1 %v1913_v18 }
 0x2d2   :  { %782 = vmatprep.subr.mxu1 %v1917_v19 }
 0x2d3   :  { %783 = vmatpush1.msra.mxu1 %v1920_v20 }
 0x2d4   :  { %784 = vmatprep.subr.mxu1 %v1923_v21 }
 0x2d5   :  { %785 = vmatpush1.msra.mxu1 %v1927_v22 }
 0x2d6   :  { %1673 = vmatmul.mubr.msk.f32.vlgmr.msra.gmra.mxu1 %vm232_vm0, %v187_v4  ;;  %948 = vmatprep.subr.mxu1 %v2022_v53 }
 0x2d7   :  { %949 = vmatpush1.msra.mxu1 %v2025_v55  ;;  %996 = vmatprep.mubr.f32.mxu1 %v1818_v13  ;;  %v1711_v6 = vpop.eup %1710 }
 0x2d8   :  { %950 = vmatprep.subr.mxu1 %v2028_v56  ;;  %v906_v8 = vmul.f32 0.5, %v1711_v6 }
 0x2d9   :  { %951 = vmatpush1.msra.mxu1 %v2032_v57 }
 0x2da   :  { %952 = vmatprep.subr.mxu1 %v2035_v58  ;;  %v908_v9 = vadd.f32 0.5, %v906_v8 }
 0x2db   :  { %953 = vmatpush1.msra.mxu1 %v2039_v59 }
 0x2dc   :  { %954 = vmatprep.subr.mxu1 %v2042_v60 }
 0x2dd   :  { %955 = vmatpush1.msra.mxu1 %v2045_v61 }
 0x2de   :  { %956 = vmatprep.subr.mxu1 %v2048_v62 }
 0x2df   :  { %957 = vmatpush1.msra.mxu1 %v2051_v63 }
 0x2e0   :  { %958 = vmatprep.subr.mxu1 %v2054_v0 }
 0x2e1   :  { %959 = vmatpush1.msra.mxu1 %v2057_v1 }
 0x2e2   :  { %960 = vmatprep.subr.mxu1 %v2060_v2 }
 0x2e3   :  { %961 = vmatpush1.msra.mxu1 %v2063_v10 }
 0x2e4   :  { %962 = vmatprep.subr.mxu1 %v2066_v15 }
 0x2e5   :  { %963 = vmatpush1.msra.mxu1 %v2069_v23 }
 0x2e6   :  { %1156 = vmatprep.subr.mxu1 %v2022_v53 }
 0x301   :  { %v376_v14 = vpop.f32.mrf.mxu1 }
 0x302   :  { %v377_v24 = vadd.f32 %v376_v14, %v2109_v40 }
 0x303   :  { %v378_v16 = vpop.f32.mrf.mxu1 }
 0x304   :  { %v379_v29 = vadd.f32 %v378_v16, %v2111_v41 }
 0x323   :  { %v924_v11 = vpop.permute.xlu0 %923 }
 0x324   :  { %v926_v12 = vmul.f32 %v924_v11, %v908_v9 }
 0x326   :  { %928 = vst.msk [vmem:[%s2409_s6] sm:$0x1f] %vm927_vm1, %v926_v12  ;;  %1674 = vmatmul.mubr.msk.f32.vlgmr.msra.gmra.mxu1 %vm232_vm0, %v926_v12 }
 0x327   :  { %1157 = vmatpush1.msra.mxu1 %v2025_v55  ;;  %1204 = vmatprep.mubr.f32.mxu1 %v1818_v13 }
 0x328   :  { %1158 = vmatprep.subr.mxu1 %v2028_v56 }
 0x329   :  { %1159 = vmatpush1.msra.mxu1 %v2032_v57 }
 0x32a   :  { %1160 = vmatprep.subr.mxu1 %v2035_v58 }
 0x32b   :  { %1161 = vmatpush1.msra.mxu1 %v2039_v59 }
 0x32c   :  { %1162 = vmatprep.subr.mxu1 %v2042_v60 }
 0x32d   :  { %1163 = vmatpush1.msra.mxu1 %v2045_v61 }
 0x32e   :  { %1164 = vmatprep.subr.mxu1 %v2048_v62 }
 0x32f   :  { %1165 = vmatpush1.msra.mxu1 %v2051_v63 }
 0x330   :  { %1166 = vmatprep.subr.mxu1 %v2054_v0 }
 0x331   :  { %1167 = vmatpush1.msra.mxu1 %v2057_v1 }
 0x332   :  { %1168 = vmatprep.subr.mxu1 %v2060_v2 }
 0x333   :  { %1169 = vmatpush1.msra.mxu1 %v2063_v10 }
 0x334   :  { %1170 = vmatprep.subr.mxu1 %v2066_v15 }
 0x335   :  { %1171 = vmatpush1.msra.mxu1 %v2069_v23 }
 0x336   :  { %1364 = vmatprep.subr.mxu1 %v2022_v53 }
 0x376   :  { %v2243_v17 = vpop.f32.mrf.mxu1 }
 0x378   :  { %v2245_v18 = vpop.f32.mrf.mxu1 }
 0x386   :  { %v2247_v19 = vpop.f32.mrf.mxu1 }
 0x388   :  { %v2249_v20 = vpop.f32.mrf.mxu1 }
 0x396   :  { %v2251_v21 = vpop.f32.mrf.mxu1 }
 0x398   :  { %v2253_v22 = vpop.f32.mrf.mxu1 }
 0x3e6   :  { %v998_v25 = vpop.f32.mrf.mxu1 }
 0x3e7   :  { %v1003_v48 = vadd.f32 %v998_v25, %v377_v24 }
 0x3e8   :  { %v1000_v52 = vpop.f32.mrf.mxu1 }
 0x3e9   :  { %v1004_v54 = vadd.f32 %v1000_v52, %v379_v29  ;;  %v1005_v28 = vmul.f32 0.5, %v1003_v48 }
 0x3eb   :  { %1712 = vtanh.f32 %v1004_v54  ;;  %v1006_v45 = vmul.f32 0.5, %v1004_v54 }
 0x3ec   :  { %1714 = vtanh.f32 %v1005_v28 }
 0x3f8   :  { %v1713_v27 = vpop.eup %1712 }
 0x3f9   :  { %1016 = vrot.lane.b32.xlu1 %v1713_v27, %s1819_s28  ;;  %v1715_v33 = vpop.eup %1714 }
 0x3fa   :  { %v1009_v35 = vmul.f32 0.5, %v1715_v33 }
 0x3fc   :  { %v1011_v36 = vadd.f32 0.5, %v1009_v35 }
 0x3fe   :  { %v1014_v43 = vmul.f32 %v1011_v36, %v2153_v49  ;;  %v451_v49 = vadd.f32 %v2096_v30, %v2109_v40 }
 0x46b   :  { %v1017_v31 = vpop.permute.xlu1 %1016 }
 0x46c   :  { %v1019_v38 = vmul.f32 %v1017_v31, %v1011_v36  ;;  %v525_v31 = vadd.f32 %v2243_v17, %v2109_v40 }
 0x46e   :  { %1021 = vrot.lane.b32.xlu0 %v1019_v38, %s1819_s28 }
 0x4e0   :  { %v1022_v44 = vpop.permute.xlu0 %1021 }
 0x4e1   :  { %v1024_v7 = vadd.f32 %v1022_v44, %v1014_v43  ;;  %v527_v43 = vadd.f32 %v2245_v18, %v2111_v41 }
 0x4e3   :  { %1716 = vtanh.f32 %v1024_v7 }
 0x4e4   :  { %1718 = vtanh.f32 %v1006_v45 }
 0x4f0   :  { %v1717_v26 = vpop.eup %1716 }
 0x4f1   :  { %1027 = vrot.lane.b32.xlu1 %v1717_v26, %s1819_s28  ;;  %v1719_v46 = vpop.eup %1718 }
 0x4f2   :  { %v1010_v47 = vmul.f32 0.5, %v1719_v46 }
 0x4f4   :  { %v1012_v50 = vadd.f32 0.5, %v1010_v47 }
 0x563   :  { %v1028_v51 = vpop.permute.xlu1 %1027 }
 0x564   :  { %v1030_v3 = vmul.f32 %v1028_v51, %v1012_v50 }
 0x566   :  { %1675 = vst.msk [vmem:[%s2409_s6 + $0x8] sm:$0x1f] %vm927_vm1, %v1030_v3  ;;  %1676 = vmatmul.mubr.msk.f32.vlgmr.msra.gmra.mxu0 %vm232_vm0, %v1030_v3 }
 0x567   :  { %1261 = vmatpush1.msra.mxu0 %v2025_v55  ;;  %1308 = vmatprep.mubr.f32.mxu0 %v1818_v13 }
 0x568   :  { %1262 = vmatprep.subr.mxu0 %v2028_v56 }
 0x569   :  { %1263 = vmatpush1.msra.mxu0 %v2032_v57 }
 0x56a   :  { %1264 = vmatprep.subr.mxu0 %v2035_v58 }
 0x56b   :  { %1265 = vmatpush1.msra.mxu0 %v2039_v59 }
 0x56c   :  { %1266 = vmatprep.subr.mxu0 %v2042_v60 }
 0x56d   :  { %1267 = vmatpush1.msra.mxu0 %v2045_v61 }
 0x56e   :  { %1268 = vmatprep.subr.mxu0 %v2048_v62 }
 0x56f   :  { %1269 = vmatpush1.msra.mxu0 %v2051_v63 }
 0x570   :  { %1270 = vmatprep.subr.mxu0 %v2054_v0 }
 0x571   :  { %1271 = vmatpush1.msra.mxu0 %v2057_v1 }
 0x572   :  { %1272 = vmatprep.subr.mxu0 %v2060_v2 }
 0x573   :  { %1273 = vmatpush1.msra.mxu0 %v2063_v10 }
 0x574   :  { %1274 = vmatprep.subr.mxu0 %v2066_v15 }
 0x575   :  { %1275 = vmatpush1.msra.mxu0 %v2069_v23 }
 0x576   :  { %1468 = vmatprep.subr.mxu0 %v2022_v53 }
 0x626   :  { %v1102_v4 = vpop.f32.mrf.mxu0 }
 0x627   :  { %v1107_v6 = vadd.f32 %v1102_v4, %v451_v49 }
 0x628   :  { %v1104_v8 = vpop.f32.mrf.mxu0 }
 0x629   :  { %v1108_v9 = vadd.f32 %v1104_v8, %v453_v5  ;;  %v1109_v12 = vmul.f32 0.5, %v1107_v6 }
 0x62b   :  { %1720 = vtanh.f32 %v1108_v9  ;;  %v1110_v54 = vmul.f32 0.5, %v1108_v9 }
 0x62c   :  { %1722 = vtanh.f32 %v1109_v12 }
 0x638   :  { %v1721_v11 = vpop.eup %1720 }
 0x639   :  { %1120 = vrot.lane.b32.xlu0 %v1721_v11, %s1819_s28  ;;  %v1723_v14 = vpop.eup %1722 }
 0x63a   :  { %v1113_v16 = vmul.f32 0.5, %v1723_v14  ;;  %v599_v14 = vadd.f32 %v2100_v34, %v2109_v40 }
 0x63c   :  { %v1115_v24 = vadd.f32 0.5, %v1113_v16 }
 0x63e   :  { %v1118_v30 = vmul.f32 %v1115_v24, %v1024_v7 }
 0x6ab   :  { %v1121_v25 = vpop.permute.xlu0 %1120 }
 0x6ac   :  { %v1123_v29 = vmul.f32 %v1121_v25, %v1115_v24  ;;  %v601_v24 = vadd.f32 %v2105_v37, %v2111_v41 }
 0x6ae   :  { %1125 = vrot.lane.b32.xlu1 %v1123_v29, %s1819_s28 }
 0x720   :  { %v1126_v48 = vpop.permute.xlu1 %1125 }
 0x721   :  { %v1128_v52 = vadd.f32 %v1126_v48, %v1118_v30 }
 0x723   :  { %1724 = vtanh.f32 %v1128_v52 }
 0x724   :  { %1726 = vtanh.f32 %v1110_v54 }
 0x730   :  { %v1725_v32 = vpop.eup %1724 }
 0x731   :  { %1131 = vrot.lane.b32.xlu0 %v1725_v32, %s1819_s28  ;;  %v1727_v27 = vpop.eup %1726 }
 0x732   :  { %v1114_v28 = vmul.f32 0.5, %v1727_v27 }
 0x734   :  { %v1116_v33 = vadd.f32 0.5, %v1114_v28 }
 0x7a3   :  { %v1132_v35 = vpop.permute.xlu0 %1131 }
 0x7a4   :  { %v1134_v36 = vmul.f32 %v1132_v35, %v1116_v33 }
 0x7a6   :  { %1677 = vst.msk [vmem:[%s2409_s6 + $0x10] sm:$0x1f] %vm927_vm1, %v1134_v36  ;;  %1678 = vmatmul.mubr.msk.f32.vlgmr.msra.gmra.mxu1 %vm232_vm0, %v1134_v36 }
 0x7a7   :  { %1365 = vmatpush1.msra.mxu1 %v2025_v55  ;;  %1412 = vmatprep.mubr.f32.mxu1 %v1818_v13 }
 0x7a8   :  { %1366 = vmatprep.subr.mxu1 %v2028_v56 }
 0x7a9   :  { %1367 = vmatpush1.msra.mxu1 %v2032_v57 }
 0x7aa   :  { %1368 = vmatprep.subr.mxu1 %v2035_v58 }
 0x7ab   :  { %1369 = vmatpush1.msra.mxu1 %v2039_v59 }
 0x7ac   :  { %1370 = vmatprep.subr.mxu1 %v2042_v60 }
 0x7ad   :  { %1371 = vmatpush1.msra.mxu1 %v2045_v61 }
 0x7ae   :  { %1372 = vmatprep.subr.mxu1 %v2048_v62 }
 0x7af   :  { %1373 = vmatpush1.msra.mxu1 %v2051_v63 }
 0x7b0   :  { %1374 = vmatprep.subr.mxu1 %v2054_v0 }
 0x7b1   :  { %1375 = vmatpush1.msra.mxu1 %v2057_v1 }
 0x7b2   :  { %1376 = vmatprep.subr.mxu1 %v2060_v2 }
 0x7b3   :  { %1377 = vmatpush1.msra.mxu1 %v2063_v10 }
 0x7b4   :  { %1378 = vmatprep.subr.mxu1 %v2066_v15 }
 0x7b5   :  { %1379 = vmatpush1.msra.mxu1 %v2069_v23 }
 0x7b6   :  { %1572 = vmatprep.subr.mxu1 %v2022_v53 }
 0x866   :  { %v1206_v38 = vpop.f32.mrf.mxu1 }
 0x867   :  { %v1211_v44 = vadd.f32 %v1206_v38, %v525_v31 }
 0x868   :  { %v1208_v7 = vpop.f32.mrf.mxu1 }
 0x869   :  { %v1212_v26 = vadd.f32 %v1208_v7, %v527_v43  ;;  %v1213_v46 = vmul.f32 0.5, %v1211_v44 }
 0x86b   :  { %1728 = vtanh.f32 %v1212_v26  ;;  %v1214_v5 = vmul.f32 0.5, %v1212_v26 }
 0x86c   :  { %1730 = vtanh.f32 %v1213_v46 }
 0x878   :  { %v1729_v45 = vpop.eup %1728 }
 0x879   :  { %1224 = vrot.lane.b32.xlu1 %v1729_v45, %s1819_s28  ;;  %v1731_v47 = vpop.eup %1730 }
 0x87a   :  { %v1217_v50 = vmul.f32 0.5, %v1731_v47 }
 0x87c   :  { %v1219_v51 = vadd.f32 0.5, %v1217_v50 }
 0x87e   :  { %v1222_v17 = vmul.f32 %v1219_v51, %v1128_v52 }
 0x8eb   :  { %v1225_v53 = vpop.permute.xlu1 %1224 }
 0x8ec   :  { %v1227_v3 = vmul.f32 %v1225_v53, %v1219_v51  ;;  %v747_v53 = vadd.f32 %v2107_v39, %v2109_v40 }
 0x8ee   :  { %1229 = vrot.lane.b32.xlu0 %v1227_v3, %s1819_s28 }
 0x960   :  { %v1230_v49 = vpop.permute.xlu0 %1229 }
 0x961   :  { %v1232_v4 = vadd.f32 %v1230_v49, %v1222_v17  ;;  %v749_v17 = vadd.f32 %v2113_v42, %v2111_v41 }
 0x963   :  { %1732 = vtanh.f32 %v1232_v4 }
 0x964   :  { %1734 = vtanh.f32 %v1214_v5 }
 0x970   :  { %v1733_v18 = vpop.eup %1732 }
 0x971   :  { %1235 = vrot.lane.b32.xlu1 %v1733_v18, %s1819_s28  ;;  %v1735_v6 = vpop.eup %1734 }
 0x972   :  { %v1218_v8 = vmul.f32 0.5, %v1735_v6 }
 0x974   :  { %v1220_v9 = vadd.f32 0.5, %v1218_v8 }
 0x9e3   :  { %v1236_v11 = vpop.permute.xlu1 %1235 }
 0x9e4   :  { %v1238_v12 = vmul.f32 %v1236_v11, %v1220_v9 }
 0x9e6   :  { %1679 = vst.msk [vmem:[%s2409_s6 + $0x18] sm:$0x1f] %vm927_vm1, %v1238_v12  ;;  %1680 = vmatmul.mubr.msk.f32.vlgmr.msra.gmra.mxu0 %vm232_vm0, %v1238_v12 }
 0x9e7   :  { %1469 = vmatpush1.msra.mxu0 %v2025_v55  ;;  %1516 = vmatprep.mubr.f32.mxu0 %v1818_v13 }
 0x9e8   :  { %1470 = vmatprep.subr.mxu0 %v2028_v56 }
 0x9e9   :  { %1471 = vmatpush1.msra.mxu0 %v2032_v57 }
 0x9ea   :  { %1472 = vmatprep.subr.mxu0 %v2035_v58 }
 0x9eb   :  { %1473 = vmatpush1.msra.mxu0 %v2039_v59 }
 0x9ec   :  { %1474 = vmatprep.subr.mxu0 %v2042_v60 }
 0x9ed   :  { %1475 = vmatpush1.msra.mxu0 %v2045_v61 }
 0x9ee   :  { %1476 = vmatprep.subr.mxu0 %v2048_v62 }
 0x9ef   :  { %1477 = vmatpush1.msra.mxu0 %v2051_v63 }
 0x9f0   :  { %1478 = vmatprep.subr.mxu0 %v2054_v0 }
 0x9f1   :  { %1479 = vmatpush1.msra.mxu0 %v2057_v1 }
 0x9f2   :  { %1480 = vmatprep.subr.mxu0 %v2060_v2 }
 0x9f3   :  { %1481 = vmatpush1.msra.mxu0 %v2063_v10 }
 0x9f4   :  { %1482 = vmatprep.subr.mxu0 %v2066_v15 }
 0x9f5   :  { %1483 = vmatpush1.msra.mxu0 %v2069_v23 }
 0xaa6   :  { %v1310_v16 = vpop.f32.mrf.mxu0 }
 0xaa7   :  { %v1315_v25 = vadd.f32 %v1310_v16, %v599_v14 }
 0xaa8   :  { %v1312_v29 = vpop.f32.mrf.mxu0 }
 0xaa9   :  { %v1316_v30 = vadd.f32 %v1312_v29, %v601_v24  ;;  %v1317_v52 = vmul.f32 0.5, %v1315_v25 }
 0xaab   :  { %1736 = vtanh.f32 %v1316_v30  ;;  %v1318_v31 = vmul.f32 0.5, %v1316_v30 }
 0xaac   :  { %1738 = vtanh.f32 %v1317_v52 }
 0xab8   :  { %v1737_v48 = vpop.eup %1736 }
 0xab9   :  { %1328 = vrot.lane.b32.xlu0 %v1737_v48, %s1819_s28  ;;  %v1739_v32 = vpop.eup %1738 }
 0xaba   :  { %v1321_v54 = vmul.f32 0.5, %v1739_v32 }
 0xabc   :  { %v1323_v27 = vadd.f32 0.5, %v1321_v54  ;;  %v821_v54 = vadd.f32 %v2251_v21, %v2109_v40 }
 0xabe   :  { %v1326_v34 = vmul.f32 %v1323_v27, %v1232_v4 }
 0xb2b   :  { %v1329_v28 = vpop.permute.xlu0 %1328 }
 0xb2c   :  { %v1331_v33 = vmul.f32 %v1329_v28, %v1323_v27  ;;  %v823_v28 = vadd.f32 %v2253_v22, %v2111_v41 }
 0xb2e   :  { %1333 = vrot.lane.b32.xlu1 %v1331_v33, %s1819_s28 }
 0xba0   :  { %v1334_v35 = vpop.permute.xlu1 %1333 }
 0xba1   :  { %v1336_v36 = vadd.f32 %v1334_v35, %v1326_v34 }
 0xba3   :  { %1740 = vtanh.f32 %v1336_v36 }
 0xba4   :  { %1742 = vtanh.f32 %v1318_v31 }
 0xbb0   :  { %v1741_v37 = vpop.eup %1740 }
 0xbb1   :  { %1339 = vrot.lane.b32.xlu0 %v1741_v37, %s1819_s28  ;;  %v1743_v38 = vpop.eup %1742 }
 0xbb2   :  { %v1322_v43 = vmul.f32 0.5, %v1743_v38 }
 0xbb4   :  { %v1324_v44 = vadd.f32 0.5, %v1322_v43 }
 0xc23   :  { %v1340_v7 = vpop.permute.xlu0 %1339 }
 0xc24   :  { %v1342_v26 = vmul.f32 %v1340_v7, %v1324_v44 }
 0xc26   :  { %1681 = vst.msk [vmem:[%s2409_s6 + $0x20] sm:$0x1f] %vm927_vm1, %v1342_v26  ;;  %1682 = vmatmul.mubr.msk.f32.vlgmr.msra.gmra.mxu1 %vm232_vm0, %v1342_v26 }
 0xc27   :  { %1573 = vmatpush1.msra.mxu1 %v2025_v55  ;;  %1620 = vmatprep.mubr.f32.mxu1 %v1818_v13  ;;  %v673_v13 = vadd.f32 %v2247_v19, %v2109_v40 }
 0xc28   :  { %1574 = vmatprep.subr.mxu1 %v2028_v56  ;;  %v675_v56 = vadd.f32 %v2249_v20, %v2111_v41 }
 0xc29   :  { %1575 = vmatpush1.msra.mxu1 %v2032_v57 }
 0xc2a   :  { %1576 = vmatprep.subr.mxu1 %v2035_v58 }
 0xc2b   :  { %1577 = vmatpush1.msra.mxu1 %v2039_v59 }
 0xc2c   :  { %1578 = vmatprep.subr.mxu1 %v2042_v60 }
 0xc2d   :  { %1579 = vmatpush1.msra.mxu1 %v2045_v61 }
 0xc2e   :  { %1580 = vmatprep.subr.mxu1 %v2048_v62 }
 0xc2f   :  { %1581 = vmatpush1.msra.mxu1 %v2051_v63 }
 0xc30   :  { %1582 = vmatprep.subr.mxu1 %v2054_v0 }
 0xc31   :  { %1583 = vmatpush1.msra.mxu1 %v2057_v1 }
 0xc32   :  { %1584 = vmatprep.subr.mxu1 %v2060_v2 }
 0xc33   :  { %1585 = vmatpush1.msra.mxu1 %v2063_v10 }
 0xc34   :  { %1586 = vmatprep.subr.mxu1 %v2066_v15 }
 0xc35   :  { %1587 = vmatpush1.msra.mxu1 %v2069_v23 }
 0xce6   :  { %v1414_v55 = vpop.f32.mrf.mxu1 }
 0xce7   :  { %v1419_v57 = vadd.f32 %v1414_v55, %v673_v13 }
 0xce8   :  { %v1416_v58 = vpop.f32.mrf.mxu1 }
 0xce9   :  { %v1420_v59 = vadd.f32 %v1416_v58, %v675_v56  ;;  %v1421_v61 = vmul.f32 0.5, %v1419_v57 }
 0xceb   :  { %1744 = vtanh.f32 %v1420_v59  ;;  %v1422_v20 = vmul.f32 0.5, %v1420_v59 }
 0xcec   :  { %1746 = vtanh.f32 %v1421_v61 }
 0xcf8   :  { %v1745_v60 = vpop.eup %1744 }
 0xcf9   :  { %1432 = vrot.lane.b32.xlu1 %v1745_v60, %s1819_s28  ;;  %v1747_v62 = vpop.eup %1746 }
 0xcfa   :  { %v1425_v63 = vmul.f32 0.5, %v1747_v62 }
 0xcfc   :  { %v1427_v0 = vadd.f32 0.5, %v1425_v63 }
 0xcfe   :  { %v1430_v10 = vmul.f32 %v1427_v0, %v1336_v36 }
 0xd6b   :  { %v1433_v1 = vpop.permute.xlu1 %1432 }
 0xd6c   :  { %v1435_v2 = vmul.f32 %v1433_v1, %v1427_v0 }
 0xd6e   :  { %1437 = vrot.lane.b32.xlu0 %v1435_v2, %s1819_s28 }
 0xde0   :  { %v1438_v15 = vpop.permute.xlu0 %1437 }
 0xde1   :  { %v1440_v23 = vadd.f32 %v1438_v15, %v1430_v10 }
 0xde3   :  { %1748 = vtanh.f32 %v1440_v23 }
 0xde4   :  { %1750 = vtanh.f32 %v1422_v20 }
 0xdf0   :  { %v1749_v19 = vpop.eup %1748 }
 0xdf1   :  { %1443 = vrot.lane.b32.xlu1 %v1749_v19, %s1819_s28  ;;  %v1751_v45 = vpop.eup %1750 }
 0xdf2   :  { %v1426_v46 = vmul.f32 0.5, %v1751_v45 }
 0xdf4   :  { %v1428_v47 = vadd.f32 0.5, %v1426_v46 }
 0xe63   :  { %v1444_v50 = vpop.permute.xlu1 %1443 }
 0xe64   :  { %v1446_v51 = vmul.f32 %v1444_v50, %v1428_v47 }
 0xe66   :  { %1683 = vst.msk [vmem:[%s2409_s6 + $0x28] sm:$0x1f] %vm927_vm1, %v1446_v51  ;;  %1684 = vmatmul.mubr.msk.f32.vlgmr.msra.gmra.mxu0 %vm232_vm0, %v1446_v51 }
 0xf26   :  { %v1518_v3 = vpop.f32.mrf.mxu0 }
 0xf27   :  { %v1523_v49 = vadd.f32 %v1518_v3, %v747_v53 }
 0xf28   :  { %v1520_v4 = vpop.f32.mrf.mxu0 }
 0xf29   :  { %v1524_v18 = vadd.f32 %v1520_v4, %v749_v17  ;;  %v1525_v6 = vmul.f32 0.5, %v1523_v49 }
 0xf2b   :  { %1752 = vtanh.f32 %v1524_v18  ;;  %v1526_v25 = vmul.f32 0.5, %v1524_v18 }
 0xf2c   :  { %1754 = vtanh.f32 %v1525_v6 }
 0xf38   :  { %v1753_v5 = vpop.eup %1752 }
 0xf39   :  { %1536 = vrot.lane.b32.xlu0 %v1753_v5, %s1819_s28  ;;  %v1755_v8 = vpop.eup %1754 }
 0xf3a   :  { %v1529_v9 = vmul.f32 0.5, %v1755_v8 }
 0xf3c   :  { %v1531_v11 = vadd.f32 0.5, %v1529_v9 }
 0xf3e   :  { %v1534_v39 = vmul.f32 %v1531_v11, %v1440_v23 }
 0xfab   :  { %v1537_v12 = vpop.permute.xlu0 %1536 }
 0xfac   :  { %v1539_v14 = vmul.f32 %v1537_v12, %v1531_v11 }
 0xfae   :  { %1541 = vrot.lane.b32.xlu1 %v1539_v14, %s1819_s28 }
0x1020   :  { %v1542_v16 = vpop.permute.xlu1 %1541 }
0x1021   :  { %v1544_v24 = vadd.f32 %v1542_v16, %v1534_v39 }
0x1023   :  { %1756 = vtanh.f32 %v1544_v24 }
0x1024   :  { %1758 = vtanh.f32 %v1526_v25 }
0x1030   :  { %v1757_v42 = vpop.eup %1756 }
0x1031   :  { %1547 = vrot.lane.b32.xlu0 %v1757_v42, %s1819_s28  ;;  %v1759_v29 = vpop.eup %1758 }
0x1032   :  { %v1530_v30 = vmul.f32 0.5, %v1759_v29 }
0x1034   :  { %v1532_v48 = vadd.f32 0.5, %v1530_v30 }
0x10a3   :  { %v1548_v52 = vpop.permute.xlu0 %1547 }
0x10a4   :  { %v1550_v32 = vmul.f32 %v1548_v52, %v1532_v48 }
0x10a6   :  { %1685 = vst.msk [vmem:[%s2409_s6 + $0x30] sm:$0x1f] %vm927_vm1, %v1550_v32  ;;  %1686 = vmatmul.mubr.msk.f32.vlgmr.msra.gmra.mxu1 %vm232_vm0, %v1550_v32 }
0x1166   :  { %v1622_v27 = vpop.f32.mrf.mxu1 }
0x1167   :  { %v1627_v33 = vadd.f32 %v1622_v27, %v821_v54 }
0x1168   :  { %v1624_v34 = vpop.f32.mrf.mxu1 }
0x1169   :  { %v1628_v35 = vadd.f32 %v1624_v34, %v823_v28  ;;  %v1629_v37 = vmul.f32 0.5, %v1627_v33 }
0x116b   :  { %1760 = vtanh.f32 %v1628_v35  ;;  %v1630_v22 = vmul.f32 0.5, %v1628_v35 }
0x116c   :  { %1762 = vtanh.f32 %v1629_v37 }
0x1178   :  { %v1761_v36 = vpop.eup %1760 }
0x1179   :  { %1640 = vrot.lane.b32.xlu1 %v1761_v36, %s1819_s28  ;;  %v1763_v31 = vpop.eup %1762 }
0x117a   :  { %v1633_v38 = vmul.f32 0.5, %v1763_v31 }
0x117c   :  { %v1635_v43 = vadd.f32 0.5, %v1633_v38 }
0x117e   :  { %v1638_v40 = vmul.f32 %v1635_v43, %v1544_v24 }
0x11eb   :  { %v1641_v44 = vpop.permute.xlu1 %1640 }
0x11ec   :  { %v1643_v7 = vmul.f32 %v1641_v44, %v1635_v43 }
0x11ee   :  { %1645 = vrot.lane.b32.xlu0 %v1643_v7, %s1819_s28 }
0x1260   :  { %v1646_v21 = vpop.permute.xlu0 %1645 }
0x1261   :  { %v1648_v26 = vadd.f32 %v1646_v21, %v1638_v40 }
0x1263   :  { %1764 = vtanh.f32 %v1648_v26 }
0x1264   :  { %1766 = vtanh.f32 %v1630_v22 }
0x1270   :  { %v1765_v41 = vpop.eup %1764 }
0x1271   :  { %1651 = vrot.lane.b32.xlu1 %v1765_v41, %s1819_s28  ;;  %v1767_v13 = vpop.eup %1766 }
0x1272   :  { %v1634_v55 = vmul.f32 0.5, %v1767_v13 }
0x1274   :  { %v1636_v56 = vadd.f32 0.5, %v1634_v55 }
0x12e3   :  { %v1652_v57 = vpop.permute.xlu1 %1651 }
0x12e4   :  { %v1654_v58 = vmul.f32 %v1652_v57, %v1636_v56 }
0x12e6   :  { %1687 = vst.msk [vmem:[%s2409_s6 + $0x38] sm:$0x1f] %vm927_vm1, %v1654_v58 }
0x12e7   :  { %1661 = vsyncpa [#allocation3], 1 }
0x12e8   :  { %1662 = vsyncpa [#allocation5], 1 }

</bundles_post_ra>
